<compile_context>
chip_gen: v7x
topology: tpu7x:2x2x1
jax: 0.10.0
libtpu: 0.0.40
codegen_flags: <defaults>
</compile_context>

<pallas_src>
import jax
import jax.numpy as jnp
from jax import lax
from jax.experimental import pallas as pl
from jax.experimental.pallas import tpu as pltpu

# ----------------------- config (small, consistent with the module) ------------------
B = 2                      # batch
L = 8                      # max sequence length
EMBED_DIM = 24
MASK_DIM = 8
DIN = EMBED_DIM + MASK_DIM       # 32  GRU input dim (embed + mask features)
HID = 32                         # config.l_hidden_size
HD = HID // 2                    # 16  per-direction GRU hidden / conv out / linear in
NCLS = 3

# ----------------------- packed weight-slab layout (rows, all 8-aligned) --------------
W_COLS  = 6 * HD                 # 96
R_WIH   = 0                      # (2*DIN, 96)  block-diag input proj, both dirs, 6 gates
R_BIH   = 64                     # (1, 96)      bih (+ folded bhh_r, bhh_z)
R_WHH   = 72                     # (2*HD, 96)   block-diag recurrent weights
R_BHHN  = 104                    # (1, 2*HD)    hidden n-gate bias (stays inside r*(...))
R_CONVW = 112                    # (3*HID, HD)  flattened conv taps [W0;W1;W2]
R_CONVB = 208                    # (1, HD)
R_LINW  = 216                    # (HD, NCLS)
R_LINB  = 232                    # (1, NCLS)
W_ROWS  = 240

# ----------------------- per-call data-slab layout -------------------------------------
# rows 0:L*B        cols 0:2*DIN      [x_fwd(t,b) | x_bwd(L-1-t,b)]        (time-major)
# rows 0:L*B        cols 2*DIN:+2*HD  [valid(t,b)*HD | valid(L-1-t,b)*HD]
# rows L*B:L*B+B    cols 0:L*B        pooling selector, pre-scaled by 1/sum(mask)
# rows L*B:L*B+B    cols 2*DIN:+NCLS  one-hot labels
D_ROWS = L * B + B


# ------------------------------- fused Pallas kernel ----------------------------------
def fused_dnm_kernel(d_ref, w_ref, scores_ref, loss_ref, tap_ref):
    # ---- hoisted, sublane-aligned static slices of the two packed slabs --------------
    X      = d_ref[0:L * B, 0:2 * DIN]                       # (16, 64)
    VALID  = d_ref[0:L * B, 2 * DIN:2 * DIN + 2 * HD]        # (16, 32)
    msel   = d_ref[L * B:L * B + B, 0:L * B]                 # (2, 16)  pre-scaled selector
    onehot = d_ref[L * B:L * B + B, 2 * DIN:2 * DIN + NCLS]  # (2, 3)

    Wih   = w_ref[R_WIH:R_WIH + 2 * DIN, :]                  # (64, 96)
    bih   = w_ref[R_BIH:R_BIH + 1, :]                        # (1, 96) incl. folded bhh_{r,z}
    Whh   = w_ref[R_WHH:R_WHH + 2 * HD, :]                   # (32, 96) blockdiag(fwd, bwd)
    bhhn  = w_ref[R_BHHN:R_BHHN + 1, 0:2 * HD]               # (1, 32)
    convw = w_ref[R_CONVW:R_CONVW + 3 * HID, 0:HD]           # (96, 16)
    convb = w_ref[R_CONVB:R_CONVB + 1, 0:HD]                 # (1, 16)
    linw  = w_ref[R_LINW:R_LINW + HD, 0:NCLS]                # (16, 3)
    linb  = w_ref[R_LINB:R_LINB + 1, 0:NCLS]                 # (1, 3)

    # input projection for BOTH directions and all 6 gates: one matmul, off the serial path
    GX = jnp.dot(X, Wih, preferred_element_type=jnp.float32) + bih       # (16, 96)
    INV_V = 1.0 - VALID                                                  # hoisted

    # ---- interleaved fwd/bwd GRU recurrence: one matmul + one sigmoid + one tanh/step ----
    h = jnp.zeros((B, 2 * HD), jnp.float32)      # [h_fwd | h_bwd]
    outs = []                                    # outs[s] = [fwd out @ t=s | bwd out @ t=L-1-s]
    for t in range(L):
        rs = t * B
        gx = GX[rs:rs + B, :]                    # (B, 96)
        v  = VALID[rs:rs + B, :]                 # (B, 32) in {0,1}
        iv = INV_V[rs:rs + B, :]
        gh = jnp.dot(h, Whh, preferred_element_type=jnp.float32)        # (B, 96)
        rz = jax.nn.sigmoid(gx[:, 0:4 * HD] + gh[:, 0:4 * HD])          # r_f r_b z_f z_b
        r = rz[:, 0:2 * HD]
        z = rz[:, 2 * HD:4 * HD]
        n = jnp.tanh(gx[:, 4 * HD:] + r * (gh[:, 4 * HD:] + bhhn))      # n_f n_b
        h_new = (1.0 - z) * n + z * h
        out = v * h_new                          # pack/pad_packed: zero past length
        h = out + iv * h                         # freeze hidden past length
        outs.append(out)

    # ---- epilogue: assemble conv tap rows [ctx(t-1)|ctx(t)|ctx(t+1)], full-width stores ----
    half = lax.broadcasted_iota(jnp.int32, (B, 2 * HD), 1) < HD          # fwd lanes selector
    zrow = jnp.zeros((B, HID), jnp.float32)
    ctx = ([zrow]
           + [jnp.where(half, outs[t], outs[L - 1 - t]) for t in range(L)]
           + [zrow])                              # ctx[t+1] = biGRU output at time t
    for t in range(L):
        tap_ref[t * B:(t + 1) * B, :] = jnp.concatenate(
            [ctx[t], ctx[t + 1], ctx[t + 2]], axis=1)                    # (B, 96)

    # ---- Conv1d(HID, HD, 3, pad=1) + ReLU as ONE matmul -------------------------------
    conv = jnp.maximum(
        jnp.dot(tap_ref[...], convw, preferred_element_type=jnp.float32) + convb, 0.0)

    # ---- masked target average pooling (denominator pre-folded into the selector) -----
    q = jnp.dot(msel, conv, preferred_element_type=jnp.float32)          # (B, HD)

    # TODO(synk): DNM episodic-memory submodule not provided; m = q pass-through.
    # F.dropout(m, 0.2, training=False) is identity at eval.
    out = jnp.dot(q, linw, preferred_element_type=jnp.float32) + linb    # (B, 3)
    mx = jnp.max(out, axis=1, keepdims=True)
    sh = out - mx
    lse = jnp.log(jnp.sum(jnp.exp(sh), axis=1, keepdims=True))
    scores = sh - lse                                                    # log_softmax(dim=1)
    scores_ref[...] = scores

    # NLLLoss (mean reduction) via the precomputed one-hot
    loss_ref[...] = -jnp.sum(onehot * scores, keepdims=True) * (1.0 / B)


# ------------------------------- parameters -------------------------------------------
def init_params(key):
    ks = jax.random.split(key, 12)

    def w(k, shape, scale=0.1):
        return (scale * jax.random.normal(k, shape)).astype(jnp.float32)

    return dict(
        # GRU: gate order [r, z, n] along the 3*HD output axis (PyTorch convention).
        wih_f=w(ks[0], (DIN, 3 * HD)), whh_f=w(ks[1], (HD, 3 * HD)),
        bih_f=w(ks[2], (1, 3 * HD)),   bhh_f=w(ks[3], (1, 3 * HD)),
        wih_b=w(ks[4], (DIN, 3 * HD)), whh_b=w(ks[5], (HD, 3 * HD)),
        bih_b=w(ks[6], (1, 3 * HD)),   bhh_b=w(ks[7], (1, 3 * HD)),
        # Conv1d(HID, HD, 3, padding=1): conv_w[k, i, o] == torch_weight[o, i, k]
        conv_w=w(ks[8], (3, HID, HD)), conv_b=w(ks[9], (1, HD)),
        # Linear(HD, 3)
        lin_w=w(ks[10], (HD, NCLS)),   lin_b=w(ks[11], (1, NCLS)),
    )


# --------------- weight slab: built ONCE outside jit (gate reorder + blockdiag) -------
def pack_weights(p):
    # target gate column order: [r_f, r_b, z_f, z_b, n_f, n_b], each HD wide
    wih_blk = jnp.zeros((2 * DIN, W_COLS), jnp.float32)
    wih_blk = wih_blk.at[0:DIN, 0 * HD:1 * HD].set(p['wih_f'][:, 0:HD])
    wih_blk = wih_blk.at[0:DIN, 2 * HD:3 * HD].set(p['wih_f'][:, HD:2 * HD])
    wih_blk = wih_blk.at[0:DIN, 4 * HD:5 * HD].set(p['wih_f'][:, 2 * HD:3 * HD])
    wih_blk = wih_blk.at[DIN:, 1 * HD:2 * HD].set(p['wih_b'][:, 0:HD])
    wih_blk = wih_blk.at[DIN:, 3 * HD:4 * HD].set(p['wih_b'][:, HD:2 * HD])
    wih_blk = wih_blk.at[DIN:, 5 * HD:6 * HD].set(p['wih_b'][:, 2 * HD:3 * HD])

    whh_blk = jnp.zeros((2 * HD, W_COLS), jnp.float32)
    whh_blk = whh_blk.at[0:HD, 0 * HD:1 * HD].set(p['whh_f'][:, 0:HD])
    whh_blk = whh_blk.at[0:HD, 2 * HD:3 * HD].set(p['whh_f'][:, HD:2 * HD])
    whh_blk = whh_blk.at[0:HD, 4 * HD:5 * HD].set(p['whh_f'][:, 2 * HD:3 * HD])
    whh_blk = whh_blk.at[HD:, 1 * HD:2 * HD].set(p['whh_b'][:, 0:HD])
    whh_blk = whh_blk.at[HD:, 3 * HD:4 * HD].set(p['whh_b'][:, HD:2 * HD])
    whh_blk = whh_blk.at[HD:, 5 * HD:6 * HD].set(p['whh_b'][:, 2 * HD:3 * HD])

    # bih with bhh_r / bhh_z folded in; bhh_n kept separate (must stay inside r*(...))
    bih = jnp.zeros((1, W_COLS), jnp.float32)
    bih = bih.at[:, 0 * HD:1 * HD].set(p['bih_f'][:, 0:HD] + p['bhh_f'][:, 0:HD])
    bih = bih.at[:, 1 * HD:2 * HD].set(p['bih_b'][:, 0:HD] + p['bhh_b'][:, 0:HD])
    bih = bih.at[:, 2 * HD:3 * HD].set(p['bih_f'][:, HD:2 * HD] + p['bhh_f'][:, HD:2 * HD])
    bih = bih.at[:, 3 * HD:4 * HD].set(p['bih_b'][:, HD:2 * HD] + p['bhh_b'][:, HD:2 * HD])
    bih = bih.at[:, 4 * HD:5 * HD].set(p['bih_f'][:, 2 * HD:3 * HD])
    bih = bih.at[:, 5 * HD:6 * HD].set(p['bih_b'][:, 2 * HD:3 * HD])

    bhhn = jnp.concatenate([p['bhh_f'][:, 2 * HD:3 * HD],
                            p['bhh_b'][:, 2 * HD:3 * HD]], axis=1)       # (1, 2*HD)

    W = jnp.zeros((W_ROWS, W_COLS), jnp.float32)
    W = W.at[R_WIH:R_WIH + 2 * DIN, :].set(wih_blk)
    W = W.at[R_BIH:R_BIH + 1, :].set(bih)
    W = W.at[R_WHH:R_WHH + 2 * HD, :].set(whh_blk)
    W = W.at[R_BHHN:R_BHHN + 1, 0:2 * HD].set(bhhn)
    W = W.at[R_CONVW:R_CONVW + 3 * HID, 0:HD].set(p['conv_w'].reshape(3 * HID, HD))
    W = W.at[R_CONVB:R_CONVB + 1, 0:HD].set(p['conv_b'])
    W = W.at[R_LINW:R_LINW + HD, 0:NCLS].set(p['lin_w'])
    W = W.at[R_LINB:R_LINB + 1, 0:NCLS].set(p['lin_b'])
    return W


# ------------------------------- forward (single fused kernel, 2 operands) ------------
@jax.jit
def forward(w_slab, sents, masks, labels, lens):
    # sents: (B, L, DIN) f32, masks: (B, L) {0,1}, labels: (B,) i32, lens: (B,) i32
    x_f = jnp.transpose(sents, (1, 0, 2))                                # (L, B, DIN)
    x_b = x_f[::-1]
    x_comb = jnp.concatenate([x_f, x_b], axis=-1).reshape(L * B, 2 * DIN)

    valid_f = (jnp.arange(L, dtype=jnp.int32)[:, None]
               < lens[None, :].astype(jnp.int32)).astype(jnp.float32)    # (L, B)
    valid_b = valid_f[::-1]
    v_comb = jnp.concatenate(
        [jnp.broadcast_to(valid_f[:, :, None], (L, B, HD)),
         jnp.broadcast_to(valid_b[:, :, None], (L, B, HD))],
        axis=-1).reshape(L * B, 2 * HD)

    top = jnp.concatenate([x_comb, v_comb], axis=1)                      # (L*B, 96)

    # pooling selector with denominator folded in (no guard: matches reference semantics,
    # an all-zero target mask would produce NaN exactly like the PyTorch module)
    masks_f = masks.astype(jnp.float32)
    den = jnp.sum(masks_f, axis=1, keepdims=True)                        # (B, 1)
    msel = (masks_f[:, :, None] *
            jnp.eye(B, dtype=jnp.float32)[:, None, :]).reshape(B, L * B) / den
    onehot = jax.nn.one_hot(labels, NCLS, dtype=jnp.float32)             # (B, 3)

    bot = jnp.zeros((B, W_COLS), jnp.float32)
    bot = bot.at[:, 0:L * B].set(msel)
    bot = bot.at[:, 2 * DIN:2 * DIN + NCLS].set(onehot)
    data = jnp.concatenate([top, bot], axis=0)                           # (D_ROWS, 96)

    scores, loss = pl.pallas_call(
        fused_dnm_kernel,
        out_shape=(jax.ShapeDtypeStruct((B, NCLS), jnp.float32),
                   jax.ShapeDtypeStruct((1, 1), jnp.float32)),
        scratch_shapes=[pltpu.VMEM((L * B, 3 * HID), jnp.float32)],
        cost_estimate=pl.CostEstimate(flops=370_000, transcendentals=1_600,
                                      bytes_accessed=100_000),
    )(data, w_slab)

    return loss[0, 0], scores


# ------------------------------- pure-JAX reference -----------------------------------
def ref_forward(params, sents, masks, labels, lens):
    def cell(x_t, h, Wih, Whh, bih, bhh):
        gx = x_t @ Wih + bih
        gh = h @ Whh + bhh
        r = jax.nn.sigmoid(gx[:, :HD] + gh[:, :HD])
        z = jax.nn.sigmoid(gx[:, HD:2 * HD] + gh[:, HD:2 * HD])
        n = jnp.tanh(gx[:, 2 * HD:] + r * gh[:, 2 * HD:])
        return (1.0 - z) * n + z * h

    lensc = lens.reshape(B, 1)
    h = jnp.zeros((B, HD)); outf = []
    for t in range(L):
        hn = cell(sents[:, t], h, params['wih_f'], params['whh_f'],
                  params['bih_f'], params['bhh_f'])
        valid = t < lensc
        h = jnp.where(valid, hn, h)
        outf.append(jnp.where(valid, h, 0.0))
    h = jnp.zeros((B, HD)); outb = [None] * L
    for t in range(L - 1, -1, -1):
        hn = cell(sents[:, t], h, params['wih_b'], params['whh_b'],
                  params['bih_b'], params['bhh_b'])
        valid = t < lensc
        h = jnp.where(valid, hn, h)
        outb[t] = jnp.where(valid, h, 0.0)
    context = jnp.concatenate([jnp.stack(outf, 1), jnp.stack(outb, 1)], -1)   # (B,L,HID)
    xpad = jnp.pad(context, ((0, 0), (1, 1), (0, 0)))
    conv = sum(jnp.einsum('bld,do->blo', xpad[:, k:k + L, :], params['conv_w'][k])
               for k in range(3)) + params['conv_b']
    conv = jnp.maximum(conv, 0.0)
    msk = masks.astype(jnp.float32)[:, :, None]
    q = jnp.sum(msk * conv, 1) / jnp.sum(msk, 1)
    out = q @ params['lin_w'] + params['lin_b']
    scores = jax.nn.log_softmax(out, axis=1)
    loss = -jnp.mean(jnp.take_along_axis(scores, labels.reshape(B, 1), 1))
    return loss, scores


# --------------------------------------- main -----------------------------------------
if __name__ == "__main__":
    key = jax.random.PRNGKey(0)
    kp, kx = jax.random.split(key)
    params = init_params(kp)
    w_slab = pack_weights(params)            # built once, outside jit

    sents = jax.random.normal(kx, (B, L, DIN), jnp.float32)        # SimpleCat output
    lens = jnp.array([8, 6], dtype=jnp.int32)                       # sorted (pack_padded)
    masks = jnp.array([[0, 0, 1, 1, 0, 0, 0, 0],
                       [0, 1, 1, 0, 0, 0, 0, 0]], dtype=jnp.int32)  # target positions
    labels = jnp.array([0, 2], dtype=jnp.int32)

    loss, scores = forward(w_slab, sents, masks, labels, lens)
    jax.block_until_ready((loss, scores))

    ref_loss, ref_scores = ref_forward(params, sents, masks, labels, lens)
    assert jnp.allclose(scores, ref_scores, atol=1e-3, rtol=1e-3), (scores, ref_scores)
    assert jnp.allclose(loss, ref_loss, atol=1e-3, rtol=1e-3), (loss, ref_loss)

    print("KERNEL_OK")
</pallas_src>

<mosaic_0001>
module attributes {stable_mosaic.version = 11 : i64} {
  func.func @fused_dnm_kernel(%arg0: memref<18x96xf32, #tpu.memory_space<vmem>>, %arg1: memref<240x96xf32, #tpu.memory_space<vmem>>, %arg2: memref<2x3xf32, #tpu.memory_space<vmem>>, %arg3: memref<1x1xf32, #tpu.memory_space<vmem>>, %arg4: memref<16x96xf32, #tpu.memory_space<vmem>>) attributes {dimension_semantics = [], scalar_prefetch = 0 : i64, scratch_operands = 1 : i64, tpu.core_type = #tpu.core_type<tc>} {
    %c0 = arith.constant 0 : index
    %c0_0 = arith.constant 0 : index
    %0 = vector.load %arg0[%c0, %c0_0] : memref<18x96xf32, #tpu.memory_space<vmem>>, vector<16x64xf32>
    %c0_1 = arith.constant 0 : index
    %c64 = arith.constant 64 : index
    %1 = vector.load %arg0[%c0_1, %c64] : memref<18x96xf32, #tpu.memory_space<vmem>>, vector<16x32xf32>
    %c16 = arith.constant 16 : index
    %c0_2 = arith.constant 0 : index
    %2 = vector.load %arg0[%c16, %c0_2] : memref<18x96xf32, #tpu.memory_space<vmem>>, vector<2x16xf32>
    %c16_3 = arith.constant 16 : index
    %c64_4 = arith.constant 64 : index
    %3 = vector.load %arg0[%c16_3, %c64_4] : memref<18x96xf32, #tpu.memory_space<vmem>>, vector<2x3xf32>
    %c0_5 = arith.constant 0 : index
    %c0_6 = arith.constant 0 : index
    %4 = vector.load %arg1[%c0_5, %c0_6] : memref<240x96xf32, #tpu.memory_space<vmem>>, vector<64x96xf32>
    %c64_7 = arith.constant 64 : index
    %c0_8 = arith.constant 0 : index
    %5 = vector.load %arg1[%c64_7, %c0_8] : memref<240x96xf32, #tpu.memory_space<vmem>>, vector<1x96xf32>
    %c72 = arith.constant 72 : index
    %c0_9 = arith.constant 0 : index
    %6 = vector.load %arg1[%c72, %c0_9] : memref<240x96xf32, #tpu.memory_space<vmem>>, vector<32x96xf32>
    %c104 = arith.constant 104 : index
    %c0_10 = arith.constant 0 : index
    %7 = vector.load %arg1[%c104, %c0_10] : memref<240x96xf32, #tpu.memory_space<vmem>>, vector<1x32xf32>
    %c112 = arith.constant 112 : index
    %c0_11 = arith.constant 0 : index
    %8 = vector.load %arg1[%c112, %c0_11] : memref<240x96xf32, #tpu.memory_space<vmem>>, vector<96x16xf32>
    %c208 = arith.constant 208 : index
    %c0_12 = arith.constant 0 : index
    %9 = vector.load %arg1[%c208, %c0_12] : memref<240x96xf32, #tpu.memory_space<vmem>>, vector<1x16xf32>
    %c216 = arith.constant 216 : index
    %c0_13 = arith.constant 0 : index
    %10 = vector.load %arg1[%c216, %c0_13] : memref<240x96xf32, #tpu.memory_space<vmem>>, vector<16x3xf32>
    %c232 = arith.constant 232 : index
    %c0_14 = arith.constant 0 : index
    %11 = vector.load %arg1[%c232, %c0_14] : memref<240x96xf32, #tpu.memory_space<vmem>>, vector<1x3xf32>
    %cst = arith.constant dense<0.000000e+00> : vector<16x96xf32>
    %12 = tpu.matmul %0, %4, %cst {dimension_numbers = #tpu.dot_dimension_numbers<[1], [0], [0], [1], [0, 0, 1, 1], [], []>} : vector<16x64xf32>, vector<64x96xf32>, vector<16x96xf32> -> vector<16x96xf32>
    %13 = vector.broadcast %5 : vector<1x96xf32> to vector<16x96xf32>
    %14 = arith.addf %12, %13 : vector<16x96xf32>
    %cst_15 = arith.constant 1.000000e+00 : f32
    %15 = vector.broadcast %cst_15 : f32 to vector<16x32xf32>
    %16 = arith.subf %15, %1 : vector<16x32xf32>
    %cst_16 = arith.constant 0.000000e+00 : f32
    %17 = vector.broadcast %cst_16 : f32 to vector<2x32xf32>
    %18 = vector.extract_strided_slice %14 {offsets = [0, 0], sizes = [2, 96], strides = [1, 1]} : vector<16x96xf32> to vector<2x96xf32>
    %19 = vector.extract_strided_slice %1 {offsets = [0, 0], sizes = [2, 32], strides = [1, 1]} : vector<16x32xf32> to vector<2x32xf32>
    %20 = vector.extract_strided_slice %16 {offsets = [0, 0], sizes = [2, 32], strides = [1, 1]} : vector<16x32xf32> to vector<2x32xf32>
    %cst_17 = arith.constant dense<0.000000e+00> : vector<2x96xf32>
    %21 = tpu.matmul %17, %6, %cst_17 {dimension_numbers = #tpu.dot_dimension_numbers<[1], [0], [0], [1], [0, 0, 1, 1], [], []>} : vector<2x32xf32>, vector<32x96xf32>, vector<2x96xf32> -> vector<2x96xf32>
    %22 = vector.extract_strided_slice %18 {offsets = [0, 0], sizes = [2, 64], strides = [1, 1]} : vector<2x96xf32> to vector<2x64xf32>
    %23 = vector.extract_strided_slice %21 {offsets = [0, 0], sizes = [2, 64], strides = [1, 1]} : vector<2x96xf32> to vector<2x64xf32>
    %24 = arith.addf %22, %23 : vector<2x64xf32>
    %25 = arith.negf %24 : vector<2x64xf32>
    %26 = math.exp %25 : vector<2x64xf32>
    %cst_18 = arith.constant 1.000000e+00 : f32
    %27 = vector.broadcast %cst_18 : f32 to vector<2x64xf32>
    %28 = arith.addf %27, %26 : vector<2x64xf32>
    %29 = arith.divf %27, %28 : vector<2x64xf32>
    %30 = vector.extract_strided_slice %29 {offsets = [0, 0], sizes = [2, 32], strides = [1, 1]} : vector<2x64xf32> to vector<2x32xf32>
    %31 = vector.extract_strided_slice %29 {offsets = [0, 32], sizes = [2, 32], strides = [1, 1]} : vector<2x64xf32> to vector<2x32xf32>
    %32 = vector.extract_strided_slice %18 {offsets = [0, 64], sizes = [2, 32], strides = [1, 1]} : vector<2x96xf32> to vector<2x32xf32>
    %33 = vector.extract_strided_slice %21 {offsets = [0, 64], sizes = [2, 32], strides = [1, 1]} : vector<2x96xf32> to vector<2x32xf32>
    %34 = vector.broadcast %7 : vector<1x32xf32> to vector<2x32xf32>
    %35 = arith.addf %33, %34 : vector<2x32xf32>
    %36 = arith.mulf %30, %35 : vector<2x32xf32>
    %37 = arith.addf %32, %36 : vector<2x32xf32>
    %38 = math.tanh %37 : vector<2x32xf32>
    %cst_19 = arith.constant 1.000000e+00 : f32
    %39 = vector.broadcast %cst_19 : f32 to vector<2x32xf32>
    %40 = arith.subf %39, %31 : vector<2x32xf32>
    %41 = arith.mulf %40, %38 : vector<2x32xf32>
    %42 = arith.mulf %31, %17 : vector<2x32xf32>
    %43 = arith.addf %41, %42 : vector<2x32xf32>
    %44 = arith.mulf %19, %43 : vector<2x32xf32>
    %45 = arith.mulf %20, %17 : vector<2x32xf32>
    %46 = arith.addf %44, %45 : vector<2x32xf32>
    %47 = vector.extract_strided_slice %14 {offsets = [2, 0], sizes = [2, 96], strides = [1, 1]} : vector<16x96xf32> to vector<2x96xf32>
    %48 = vector.extract_strided_slice %1 {offsets = [2, 0], sizes = [2, 32], strides = [1, 1]} : vector<16x32xf32> to vector<2x32xf32>
    %49 = vector.extract_strided_slice %16 {offsets = [2, 0], sizes = [2, 32], strides = [1, 1]} : vector<16x32xf32> to vector<2x32xf32>
    %cst_20 = arith.constant dense<0.000000e+00> : vector<2x96xf32>
    %50 = tpu.matmul %46, %6, %cst_20 {dimension_numbers = #tpu.dot_dimension_numbers<[1], [0], [0], [1], [0, 0, 1, 1], [], []>} : vector<2x32xf32>, vector<32x96xf32>, vector<2x96xf32> -> vector<2x96xf32>
    %51 = vector.extract_strided_slice %47 {offsets = [0, 0], sizes = [2, 64], strides = [1, 1]} : vector<2x96xf32> to vector<2x64xf32>
    %52 = vector.extract_strided_slice %50 {offsets = [0, 0], sizes = [2, 64], strides = [1, 1]} : vector<2x96xf32> to vector<2x64xf32>
    %53 = arith.addf %51, %52 : vector<2x64xf32>
    %54 = arith.negf %53 : vector<2x64xf32>
    %55 = math.exp %54 : vector<2x64xf32>
    %cst_21 = arith.constant 1.000000e+00 : f32
    %56 = vector.broadcast %cst_21 : f32 to vector<2x64xf32>
    %57 = arith.addf %56, %55 : vector<2x64xf32>
    %58 = arith.divf %56, %57 : vector<2x64xf32>
    %59 = vector.extract_strided_slice %58 {offsets = [0, 0], sizes = [2, 32], strides = [1, 1]} : vector<2x64xf32> to vector<2x32xf32>
    %60 = vector.extract_strided_slice %58 {offsets = [0, 32], sizes = [2, 32], strides = [1, 1]} : vector<2x64xf32> to vector<2x32xf32>
    %61 = vector.extract_strided_slice %47 {offsets = [0, 64], sizes = [2, 32], strides = [1, 1]} : vector<2x96xf32> to vector<2x32xf32>
    %62 = vector.extract_strided_slice %50 {offsets = [0, 64], sizes = [2, 32], strides = [1, 1]} : vector<2x96xf32> to vector<2x32xf32>
    %63 = vector.broadcast %7 : vector<1x32xf32> to vector<2x32xf32>
    %64 = arith.addf %62, %63 : vector<2x32xf32>
    %65 = arith.mulf %59, %64 : vector<2x32xf32>
    %66 = arith.addf %61, %65 : vector<2x32xf32>
    %67 = math.tanh %66 : vector<2x32xf32>
    %cst_22 = arith.constant 1.000000e+00 : f32
    %68 = vector.broadcast %cst_22 : f32 to vector<2x32xf32>
    %69 = arith.subf %68, %60 : vector<2x32xf32>
    %70 = arith.mulf %69, %67 : vector<2x32xf32>
    %71 = arith.mulf %60, %46 : vector<2x32xf32>
    %72 = arith.addf %70, %71 : vector<2x32xf32>
    %73 = arith.mulf %48, %72 : vector<2x32xf32>
    %74 = arith.mulf %49, %46 : vector<2x32xf32>
    %75 = arith.addf %73, %74 : vector<2x32xf32>
    %76 = vector.extract_strided_slice %14 {offsets = [4, 0], sizes = [2, 96], strides = [1, 1]} : vector<16x96xf32> to vector<2x96xf32>
    %77 = vector.extract_strided_slice %1 {offsets = [4, 0], sizes = [2, 32], strides = [1, 1]} : vector<16x32xf32> to vector<2x32xf32>
    %78 = vector.extract_strided_slice %16 {offsets = [4, 0], sizes = [2, 32], strides = [1, 1]} : vector<16x32xf32> to vector<2x32xf32>
    %cst_23 = arith.constant dense<0.000000e+00> : vector<2x96xf32>
    %79 = tpu.matmul %75, %6, %cst_23 {dimension_numbers = #tpu.dot_dimension_numbers<[1], [0], [0], [1], [0, 0, 1, 1], [], []>} : vector<2x32xf32>, vector<32x96xf32>, vector<2x96xf32> -> vector<2x96xf32>
    %80 = vector.extract_strided_slice %76 {offsets = [0, 0], sizes = [2, 64], strides = [1, 1]} : vector<2x96xf32> to vector<2x64xf32>
    %81 = vector.extract_strided_slice %79 {offsets = [0, 0], sizes = [2, 64], strides = [1, 1]} : vector<2x96xf32> to vector<2x64xf32>
    %82 = arith.addf %80, %81 : vector<2x64xf32>
    %83 = arith.negf %82 : vector<2x64xf32>
    %84 = math.exp %83 : vector<2x64xf32>
    %cst_24 = arith.constant 1.000000e+00 : f32
    %85 = vector.broadcast %cst_24 : f32 to vector<2x64xf32>
    %86 = arith.addf %85, %84 : vector<2x64xf32>
    %87 = arith.divf %85, %86 : vector<2x64xf32>
    %88 = vector.extract_strided_slice %87 {offsets = [0, 0], sizes = [2, 32], strides = [1, 1]} : vector<2x64xf32> to vector<2x32xf32>
    %89 = vector.extract_strided_slice %87 {offsets = [0, 32], sizes = [2, 32], strides = [1, 1]} : vector<2x64xf32> to vector<2x32xf32>
    %90 = vector.extract_strided_slice %76 {offsets = [0, 64], sizes = [2, 32], strides = [1, 1]} : vector<2x96xf32> to vector<2x32xf32>
    %91 = vector.extract_strided_slice %79 {offsets = [0, 64], sizes = [2, 32], strides = [1, 1]} : vector<2x96xf32> to vector<2x32xf32>
    %92 = vector.broadcast %7 : vector<1x32xf32> to vector<2x32xf32>
    %93 = arith.addf %91, %92 : vector<2x32xf32>
    %94 = arith.mulf %88, %93 : vector<2x32xf32>
    %95 = arith.addf %90, %94 : vector<2x32xf32>
    %96 = math.tanh %95 : vector<2x32xf32>
    %cst_25 = arith.constant 1.000000e+00 : f32
    %97 = vector.broadcast %cst_25 : f32 to vector<2x32xf32>
    %98 = arith.subf %97, %89 : vector<2x32xf32>
    %99 = arith.mulf %98, %96 : vector<2x32xf32>
    %100 = arith.mulf %89, %75 : vector<2x32xf32>
    %101 = arith.addf %99, %100 : vector<2x32xf32>
    %102 = arith.mulf %77, %101 : vector<2x32xf32>
    %103 = arith.mulf %78, %75 : vector<2x32xf32>
    %104 = arith.addf %102, %103 : vector<2x32xf32>
    %105 = vector.extract_strided_slice %14 {offsets = [6, 0], sizes = [2, 96], strides = [1, 1]} : vector<16x96xf32> to vector<2x96xf32>
    %106 = vector.extract_strided_slice %1 {offsets = [6, 0], sizes = [2, 32], strides = [1, 1]} : vector<16x32xf32> to vector<2x32xf32>
    %107 = vector.extract_strided_slice %16 {offsets = [6, 0], sizes = [2, 32], strides = [1, 1]} : vector<16x32xf32> to vector<2x32xf32>
    %cst_26 = arith.constant dense<0.000000e+00> : vector<2x96xf32>
    %108 = tpu.matmul %104, %6, %cst_26 {dimension_numbers = #tpu.dot_dimension_numbers<[1], [0], [0], [1], [0, 0, 1, 1], [], []>} : vector<2x32xf32>, vector<32x96xf32>, vector<2x96xf32> -> vector<2x96xf32>
    %109 = vector.extract_strided_slice %105 {offsets = [0, 0], sizes = [2, 64], strides = [1, 1]} : vector<2x96xf32> to vector<2x64xf32>
    %110 = vector.extract_strided_slice %108 {offsets = [0, 0], sizes = [2, 64], strides = [1, 1]} : vector<2x96xf32> to vector<2x64xf32>
    %111 = arith.addf %109, %110 : vector<2x64xf32>
    %112 = arith.negf %111 : vector<2x64xf32>
    %113 = math.exp %112 : vector<2x64xf32>
    %cst_27 = arith.constant 1.000000e+00 : f32
    %114 = vector.broadcast %cst_27 : f32 to vector<2x64xf32>
    %115 = arith.addf %114, %113 : vector<2x64xf32>
    %116 = arith.divf %114, %115 : vector<2x64xf32>
    %117 = vector.extract_strided_slice %116 {offsets = [0, 0], sizes = [2, 32], strides = [1, 1]} : vector<2x64xf32> to vector<2x32xf32>
    %118 = vector.extract_strided_slice %116 {offsets = [0, 32], sizes = [2, 32], strides = [1, 1]} : vector<2x64xf32> to vector<2x32xf32>
    %119 = vector.extract_strided_slice %105 {offsets = [0, 64], sizes = [2, 32], strides = [1, 1]} : vector<2x96xf32> to vector<2x32xf32>
    %120 = vector.extract_strided_slice %108 {offsets = [0, 64], sizes = [2, 32], strides = [1, 1]} : vector<2x96xf32> to vector<2x32xf32>
    %121 = vector.broadcast %7 : vector<1x32xf32> to vector<2x32xf32>
    %122 = arith.addf %120, %121 : vector<2x32xf32>
    %123 = arith.mulf %117, %122 : vector<2x32xf32>
    %124 = arith.addf %119, %123 : vector<2x32xf32>
    %125 = math.tanh %124 : vector<2x32xf32>
    %cst_28 = arith.constant 1.000000e+00 : f32
    %126 = vector.broadcast %cst_28 : f32 to vector<2x32xf32>
    %127 = arith.subf %126, %118 : vector<2x32xf32>
    %128 = arith.mulf %127, %125 : vector<2x32xf32>
    %129 = arith.mulf %118, %104 : vector<2x32xf32>
    %130 = arith.addf %128, %129 : vector<2x32xf32>
    %131 = arith.mulf %106, %130 : vector<2x32xf32>
    %132 = arith.mulf %107, %104 : vector<2x32xf32>
    %133 = arith.addf %131, %132 : vector<2x32xf32>
    %134 = vector.extract_strided_slice %14 {offsets = [8, 0], sizes = [2, 96], strides = [1, 1]} : vector<16x96xf32> to vector<2x96xf32>
    %135 = vector.extract_strided_slice %1 {offsets = [8, 0], sizes = [2, 32], strides = [1, 1]} : vector<16x32xf32> to vector<2x32xf32>
    %136 = vector.extract_strided_slice %16 {offsets = [8, 0], sizes = [2, 32], strides = [1, 1]} : vector<16x32xf32> to vector<2x32xf32>
    %cst_29 = arith.constant dense<0.000000e+00> : vector<2x96xf32>
    %137 = tpu.matmul %133, %6, %cst_29 {dimension_numbers = #tpu.dot_dimension_numbers<[1], [0], [0], [1], [0, 0, 1, 1], [], []>} : vector<2x32xf32>, vector<32x96xf32>, vector<2x96xf32> -> vector<2x96xf32>
    %138 = vector.extract_strided_slice %134 {offsets = [0, 0], sizes = [2, 64], strides = [1, 1]} : vector<2x96xf32> to vector<2x64xf32>
    %139 = vector.extract_strided_slice %137 {offsets = [0, 0], sizes = [2, 64], strides = [1, 1]} : vector<2x96xf32> to vector<2x64xf32>
    %140 = arith.addf %138, %139 : vector<2x64xf32>
    %141 = arith.negf %140 : vector<2x64xf32>
    %142 = math.exp %141 : vector<2x64xf32>
    %cst_30 = arith.constant 1.000000e+00 : f32
    %143 = vector.broadcast %cst_30 : f32 to vector<2x64xf32>
    %144 = arith.addf %143, %142 : vector<2x64xf32>
    %145 = arith.divf %143, %144 : vector<2x64xf32>
    %146 = vector.extract_strided_slice %145 {offsets = [0, 0], sizes = [2, 32], strides = [1, 1]} : vector<2x64xf32> to vector<2x32xf32>
    %147 = vector.extract_strided_slice %145 {offsets = [0, 32], sizes = [2, 32], strides = [1, 1]} : vector<2x64xf32> to vector<2x32xf32>
    %148 = vector.extract_strided_slice %134 {offsets = [0, 64], sizes = [2, 32], strides = [1, 1]} : vector<2x96xf32> to vector<2x32xf32>
    %149 = vector.extract_strided_slice %137 {offsets = [0, 64], sizes = [2, 32], strides = [1, 1]} : vector<2x96xf32> to vector<2x32xf32>
    %150 = vector.broadcast %7 : vector<1x32xf32> to vector<2x32xf32>
    %151 = arith.addf %149, %150 : vector<2x32xf32>
    %152 = arith.mulf %146, %151 : vector<2x32xf32>
    %153 = arith.addf %148, %152 : vector<2x32xf32>
    %154 = math.tanh %153 : vector<2x32xf32>
    %cst_31 = arith.constant 1.000000e+00 : f32
    %155 = vector.broadcast %cst_31 : f32 to vector<2x32xf32>
    %156 = arith.subf %155, %147 : vector<2x32xf32>
    %157 = arith.mulf %156, %154 : vector<2x32xf32>
    %158 = arith.mulf %147, %133 : vector<2x32xf32>
    %159 = arith.addf %157, %158 : vector<2x32xf32>
    %160 = arith.mulf %135, %159 : vector<2x32xf32>
    %161 = arith.mulf %136, %133 : vector<2x32xf32>
    %162 = arith.addf %160, %161 : vector<2x32xf32>
    %163 = vector.extract_strided_slice %14 {offsets = [10, 0], sizes = [2, 96], strides = [1, 1]} : vector<16x96xf32> to vector<2x96xf32>
    %164 = vector.extract_strided_slice %1 {offsets = [10, 0], sizes = [2, 32], strides = [1, 1]} : vector<16x32xf32> to vector<2x32xf32>
    %165 = vector.extract_strided_slice %16 {offsets = [10, 0], sizes = [2, 32], strides = [1, 1]} : vector<16x32xf32> to vector<2x32xf32>
    %cst_32 = arith.constant dense<0.000000e+00> : vector<2x96xf32>
    %166 = tpu.matmul %162, %6, %cst_32 {dimension_numbers = #tpu.dot_dimension_numbers<[1], [0], [0], [1], [0, 0, 1, 1], [], []>} : vector<2x32xf32>, vector<32x96xf32>, vector<2x96xf32> -> vector<2x96xf32>
    %167 = vector.extract_strided_slice %163 {offsets = [0, 0], sizes = [2, 64], strides = [1, 1]} : vector<2x96xf32> to vector<2x64xf32>
    %168 = vector.extract_strided_slice %166 {offsets = [0, 0], sizes = [2, 64], strides = [1, 1]} : vector<2x96xf32> to vector<2x64xf32>
    %169 = arith.addf %167, %168 : vector<2x64xf32>
    %170 = arith.negf %169 : vector<2x64xf32>
    %171 = math.exp %170 : vector<2x64xf32>
    %cst_33 = arith.constant 1.000000e+00 : f32
    %172 = vector.broadcast %cst_33 : f32 to vector<2x64xf32>
    %173 = arith.addf %172, %171 : vector<2x64xf32>
    %174 = arith.divf %172, %173 : vector<2x64xf32>
    %175 = vector.extract_strided_slice %174 {offsets = [0, 0], sizes = [2, 32], strides = [1, 1]} : vector<2x64xf32> to vector<2x32xf32>
    %176 = vector.extract_strided_slice %174 {offsets = [0, 32], sizes = [2, 32], strides = [1, 1]} : vector<2x64xf32> to vector<2x32xf32>
    %177 = vector.extract_strided_slice %163 {offsets = [0, 64], sizes = [2, 32], strides = [1, 1]} : vector<2x96xf32> to vector<2x32xf32>
    %178 = vector.extract_strided_slice %166 {offsets = [0, 64], sizes = [2, 32], strides = [1, 1]} : vector<2x96xf32> to vector<2x32xf32>
    %179 = vector.broadcast %7 : vector<1x32xf32> to vector<2x32xf32>
    %180 = arith.addf %178, %179 : vector<2x32xf32>
    %181 = arith.mulf %175, %180 : vector<2x32xf32>
    %182 = arith.addf %177, %181 : vector<2x32xf32>
    %183 = math.tanh %182 : vector<2x32xf32>
    %cst_34 = arith.constant 1.000000e+00 : f32
    %184 = vector.broadcast %cst_34 : f32 to vector<2x32xf32>
    %185 = arith.subf %184, %176 : vector<2x32xf32>
    %186 = arith.mulf %185, %183 : vector<2x32xf32>
    %187 = arith.mulf %176, %162 : vector<2x32xf32>
    %188 = arith.addf %186, %187 : vector<2x32xf32>
    %189 = arith.mulf %164, %188 : vector<2x32xf32>
    %190 = arith.mulf %165, %162 : vector<2x32xf32>
    %191 = arith.addf %189, %190 : vector<2x32xf32>
    %192 = vector.extract_strided_slice %14 {offsets = [12, 0], sizes = [2, 96], strides = [1, 1]} : vector<16x96xf32> to vector<2x96xf32>
    %193 = vector.extract_strided_slice %1 {offsets = [12, 0], sizes = [2, 32], strides = [1, 1]} : vector<16x32xf32> to vector<2x32xf32>
    %194 = vector.extract_strided_slice %16 {offsets = [12, 0], sizes = [2, 32], strides = [1, 1]} : vector<16x32xf32> to vector<2x32xf32>
    %cst_35 = arith.constant dense<0.000000e+00> : vector<2x96xf32>
    %195 = tpu.matmul %191, %6, %cst_35 {dimension_numbers = #tpu.dot_dimension_numbers<[1], [0], [0], [1], [0, 0, 1, 1], [], []>} : vector<2x32xf32>, vector<32x96xf32>, vector<2x96xf32> -> vector<2x96xf32>
    %196 = vector.extract_strided_slice %192 {offsets = [0, 0], sizes = [2, 64], strides = [1, 1]} : vector<2x96xf32> to vector<2x64xf32>
    %197 = vector.extract_strided_slice %195 {offsets = [0, 0], sizes = [2, 64], strides = [1, 1]} : vector<2x96xf32> to vector<2x64xf32>
    %198 = arith.addf %196, %197 : vector<2x64xf32>
    %199 = arith.negf %198 : vector<2x64xf32>
    %200 = math.exp %199 : vector<2x64xf32>
    %cst_36 = arith.constant 1.000000e+00 : f32
    %201 = vector.broadcast %cst_36 : f32 to vector<2x64xf32>
    %202 = arith.addf %201, %200 : vector<2x64xf32>
    %203 = arith.divf %201, %202 : vector<2x64xf32>
    %204 = vector.extract_strided_slice %203 {offsets = [0, 0], sizes = [2, 32], strides = [1, 1]} : vector<2x64xf32> to vector<2x32xf32>
    %205 = vector.extract_strided_slice %203 {offsets = [0, 32], sizes = [2, 32], strides = [1, 1]} : vector<2x64xf32> to vector<2x32xf32>
    %206 = vector.extract_strided_slice %192 {offsets = [0, 64], sizes = [2, 32], strides = [1, 1]} : vector<2x96xf32> to vector<2x32xf32>
    %207 = vector.extract_strided_slice %195 {offsets = [0, 64], sizes = [2, 32], strides = [1, 1]} : vector<2x96xf32> to vector<2x32xf32>
    %208 = vector.broadcast %7 : vector<1x32xf32> to vector<2x32xf32>
    %209 = arith.addf %207, %208 : vector<2x32xf32>
    %210 = arith.mulf %204, %209 : vector<2x32xf32>
    %211 = arith.addf %206, %210 : vector<2x32xf32>
    %212 = math.tanh %211 : vector<2x32xf32>
    %cst_37 = arith.constant 1.000000e+00 : f32
    %213 = vector.broadcast %cst_37 : f32 to vector<2x32xf32>
    %214 = arith.subf %213, %205 : vector<2x32xf32>
    %215 = arith.mulf %214, %212 : vector<2x32xf32>
    %216 = arith.mulf %205, %191 : vector<2x32xf32>
    %217 = arith.addf %215, %216 : vector<2x32xf32>
    %218 = arith.mulf %193, %217 : vector<2x32xf32>
    %219 = arith.mulf %194, %191 : vector<2x32xf32>
    %220 = arith.addf %218, %219 : vector<2x32xf32>
    %221 = vector.extract_strided_slice %14 {offsets = [14, 0], sizes = [2, 96], strides = [1, 1]} : vector<16x96xf32> to vector<2x96xf32>
    %222 = vector.extract_strided_slice %1 {offsets = [14, 0], sizes = [2, 32], strides = [1, 1]} : vector<16x32xf32> to vector<2x32xf32>
    %cst_38 = arith.constant dense<0.000000e+00> : vector<2x96xf32>
    %223 = tpu.matmul %220, %6, %cst_38 {dimension_numbers = #tpu.dot_dimension_numbers<[1], [0], [0], [1], [0, 0, 1, 1], [], []>} : vector<2x32xf32>, vector<32x96xf32>, vector<2x96xf32> -> vector<2x96xf32>
    %224 = vector.extract_strided_slice %221 {offsets = [0, 0], sizes = [2, 64], strides = [1, 1]} : vector<2x96xf32> to vector<2x64xf32>
    %225 = vector.extract_strided_slice %223 {offsets = [0, 0], sizes = [2, 64], strides = [1, 1]} : vector<2x96xf32> to vector<2x64xf32>
    %226 = arith.addf %224, %225 : vector<2x64xf32>
    %227 = arith.negf %226 : vector<2x64xf32>
    %228 = math.exp %227 : vector<2x64xf32>
    %cst_39 = arith.constant 1.000000e+00 : f32
    %229 = vector.broadcast %cst_39 : f32 to vector<2x64xf32>
    %230 = arith.addf %229, %228 : vector<2x64xf32>
    %231 = arith.divf %229, %230 : vector<2x64xf32>
    %232 = vector.extract_strided_slice %231 {offsets = [0, 0], sizes = [2, 32], strides = [1, 1]} : vector<2x64xf32> to vector<2x32xf32>
    %233 = vector.extract_strided_slice %231 {offsets = [0, 32], sizes = [2, 32], strides = [1, 1]} : vector<2x64xf32> to vector<2x32xf32>
    %234 = vector.extract_strided_slice %221 {offsets = [0, 64], sizes = [2, 32], strides = [1, 1]} : vector<2x96xf32> to vector<2x32xf32>
    %235 = vector.extract_strided_slice %223 {offsets = [0, 64], sizes = [2, 32], strides = [1, 1]} : vector<2x96xf32> to vector<2x32xf32>
    %236 = vector.broadcast %7 : vector<1x32xf32> to vector<2x32xf32>
    %237 = arith.addf %235, %236 : vector<2x32xf32>
    %238 = arith.mulf %232, %237 : vector<2x32xf32>
    %239 = arith.addf %234, %238 : vector<2x32xf32>
    %240 = math.tanh %239 : vector<2x32xf32>
    %cst_40 = arith.constant 1.000000e+00 : f32
    %241 = vector.broadcast %cst_40 : f32 to vector<2x32xf32>
    %242 = arith.subf %241, %233 : vector<2x32xf32>
    %243 = arith.mulf %242, %240 : vector<2x32xf32>
    %244 = arith.mulf %233, %220 : vector<2x32xf32>
    %245 = arith.addf %243, %244 : vector<2x32xf32>
    %246 = arith.mulf %222, %245 : vector<2x32xf32>
    %247 = tpu.iota {dimensions = array<i32: 1>} : vector<2x32xi32>
    %c16_i32 = arith.constant 16 : i32
    %248 = vector.broadcast %c16_i32 : i32 to vector<2x32xi32>
    %249 = arith.cmpi slt, %247, %248 : vector<2x32xi32>
    %cst_41 = arith.constant 0.000000e+00 : f32
    %250 = vector.broadcast %cst_41 : f32 to vector<2x32xf32>
    %251 = arith.select %249, %44, %246 : vector<2x32xi1>, vector<2x32xf32>
    %252 = arith.select %249, %73, %218 : vector<2x32xi1>, vector<2x32xf32>
    %253 = arith.select %249, %102, %189 : vector<2x32xi1>, vector<2x32xf32>
    %254 = arith.select %249, %131, %160 : vector<2x32xi1>, vector<2x32xf32>
    %255 = arith.select %249, %160, %131 : vector<2x32xi1>, vector<2x32xf32>
    %256 = arith.select %249, %189, %102 : vector<2x32xi1>, vector<2x32xf32>
    %257 = arith.select %249, %218, %73 : vector<2x32xi1>, vector<2x32xf32>
    %258 = arith.select %249, %246, %44 : vector<2x32xi1>, vector<2x32xf32>
    %259 = tpu.concatenate %250, %251, %252 in 1 : vector<2x32xf32>, vector<2x32xf32>, vector<2x32xf32> -> vector<2x96xf32>
    %c0_42 = arith.constant 0 : index
    %c0_43 = arith.constant 0 : index
    %260 = vector.load %arg4[%c0_42, %c0_43] : memref<16x96xf32, #tpu.memory_space<vmem>>, vector<2x96xf32>
    tpu.vector_store %arg4[%c0_42, %c0_43], %259 {strides = array<i32>} : memref<16x96xf32, #tpu.memory_space<vmem>>, vector<2x96xf32>,
    %261 = tpu.concatenate %251, %252, %253 in 1 : vector<2x32xf32>, vector<2x32xf32>, vector<2x32xf32> -> vector<2x96xf32>
    %c2 = arith.constant 2 : index
    %c0_44 = arith.constant 0 : index
    %262 = vector.load %arg4[%c2, %c0_44] : memref<16x96xf32, #tpu.memory_space<vmem>>, vector<2x96xf32>
    tpu.vector_store %arg4[%c2, %c0_44], %261 {strides = array<i32>} : memref<16x96xf32, #tpu.memory_space<vmem>>, vector<2x96xf32>,
    %263 = tpu.concatenate %252, %253, %254 in 1 : vector<2x32xf32>, vector<2x32xf32>, vector<2x32xf32> -> vector<2x96xf32>
    %c4 = arith.constant 4 : index
    %c0_45 = arith.constant 0 : index
    %264 = vector.load %arg4[%c4, %c0_45] : memref<16x96xf32, #tpu.memory_space<vmem>>, vector<2x96xf32>
    tpu.vector_store %arg4[%c4, %c0_45], %263 {strides = array<i32>} : memref<16x96xf32, #tpu.memory_space<vmem>>, vector<2x96xf32>,
    %265 = tpu.concatenate %253, %254, %255 in 1 : vector<2x32xf32>, vector<2x32xf32>, vector<2x32xf32> -> vector<2x96xf32>
    %c6 = arith.constant 6 : index
    %c0_46 = arith.constant 0 : index
    %266 = vector.load %arg4[%c6, %c0_46] : memref<16x96xf32, #tpu.memory_space<vmem>>, vector<2x96xf32>
    tpu.vector_store %arg4[%c6, %c0_46], %265 {strides = array<i32>} : memref<16x96xf32, #tpu.memory_space<vmem>>, vector<2x96xf32>,
    %267 = tpu.concatenate %254, %255, %256 in 1 : vector<2x32xf32>, vector<2x32xf32>, vector<2x32xf32> -> vector<2x96xf32>
    %c8 = arith.constant 8 : index
    %c0_47 = arith.constant 0 : index
    %268 = vector.load %arg4[%c8, %c0_47] : memref<16x96xf32, #tpu.memory_space<vmem>>, vector<2x96xf32>
    tpu.vector_store %arg4[%c8, %c0_47], %267 {strides = array<i32>} : memref<16x96xf32, #tpu.memory_space<vmem>>, vector<2x96xf32>,
    %269 = tpu.concatenate %255, %256, %257 in 1 : vector<2x32xf32>, vector<2x32xf32>, vector<2x32xf32> -> vector<2x96xf32>
    %c10 = arith.constant 10 : index
    %c0_48 = arith.constant 0 : index
    %270 = vector.load %arg4[%c10, %c0_48] : memref<16x96xf32, #tpu.memory_space<vmem>>, vector<2x96xf32>
    tpu.vector_store %arg4[%c10, %c0_48], %269 {strides = array<i32>} : memref<16x96xf32, #tpu.memory_space<vmem>>, vector<2x96xf32>,
    %271 = tpu.concatenate %256, %257, %258 in 1 : vector<2x32xf32>, vector<2x32xf32>, vector<2x32xf32> -> vector<2x96xf32>
    %c12 = arith.constant 12 : index
    %c0_49 = arith.constant 0 : index
    %272 = vector.load %arg4[%c12, %c0_49] : memref<16x96xf32, #tpu.memory_space<vmem>>, vector<2x96xf32>
    tpu.vector_store %arg4[%c12, %c0_49], %271 {strides = array<i32>} : memref<16x96xf32, #tpu.memory_space<vmem>>, vector<2x96xf32>,
    %273 = tpu.concatenate %257, %258, %250 in 1 : vector<2x32xf32>, vector<2x32xf32>, vector<2x32xf32> -> vector<2x96xf32>
    %c14 = arith.constant 14 : index
    %c0_50 = arith.constant 0 : index
    %274 = vector.load %arg4[%c14, %c0_50] : memref<16x96xf32, #tpu.memory_space<vmem>>, vector<2x96xf32>
    tpu.vector_store %arg4[%c14, %c0_50], %273 {strides = array<i32>} : memref<16x96xf32, #tpu.memory_space<vmem>>, vector<2x96xf32>,
    %c0_51 = arith.constant 0 : index
    %c0_52 = arith.constant 0 : index
    %275 = vector.load %arg4[%c0_51, %c0_52] : memref<16x96xf32, #tpu.memory_space<vmem>>, vector<16x96xf32>
    %cst_53 = arith.constant dense<0.000000e+00> : vector<16x16xf32>
    %276 = tpu.matmul %275, %8, %cst_53 {dimension_numbers = #tpu.dot_dimension_numbers<[1], [0], [0], [1], [0, 0, 1, 1], [], []>} : vector<16x96xf32>, vector<96x16xf32>, vector<16x16xf32> -> vector<16x16xf32>
    %277 = vector.broadcast %9 : vector<1x16xf32> to vector<16x16xf32>
    %278 = arith.addf %276, %277 : vector<16x16xf32>
    %cst_54 = arith.constant 0.000000e+00 : f32
    %279 = vector.broadcast %cst_54 : f32 to vector<16x16xf32>
    %280 = arith.maximumf %278, %279 : vector<16x16xf32>
    %cst_55 = arith.constant dense<0.000000e+00> : vector<2x16xf32>
    %281 = tpu.matmul %2, %280, %cst_55 {dimension_numbers = #tpu.dot_dimension_numbers<[1], [0], [0], [1], [0, 0, 1, 1], [], []>} : vector<2x16xf32>, vector<16x16xf32>, vector<2x16xf32> -> vector<2x16xf32>
    %cst_56 = arith.constant dense<0.000000e+00> : vector<2x3xf32>
    %282 = tpu.matmul %281, %10, %cst_56 {dimension_numbers = #tpu.dot_dimension_numbers<[1], [0], [0], [1], [0, 0, 1, 1], [], []>} : vector<2x16xf32>, vector<16x3xf32>, vector<2x3xf32> -> vector<2x3xf32>
    %283 = vector.broadcast %11 : vector<1x3xf32> to vector<2x3xf32>
    %284 = arith.addf %282, %283 : vector<2x3xf32>
    %cst_57 = arith.constant dense<0xFF800000> : vector<2xf32>
    %285 = vector.multi_reduction <maximumf>, %284, %cst_57 [1] : vector<2x3xf32> to vector<2xf32>
    %286 = vector.shape_cast %285 : vector<2xf32> to vector<2x1xf32>
    %287 = vector.broadcast %286 : vector<2x1xf32> to vector<2x3xf32>
    %288 = arith.subf %284, %287 : vector<2x3xf32>
    %289 = math.exp %288 : vector<2x3xf32>
    %cst_58 = arith.constant dense<0.000000e+00> : vector<2xf32>
    %290 = vector.multi_reduction <add>, %289, %cst_58 [1] : vector<2x3xf32> to vector<2xf32>
    %291 = vector.shape_cast %290 : vector<2xf32> to vector<2x1xf32>
    %292 = math.log %291 : vector<2x1xf32>
    %293 = vector.broadcast %292 : vector<2x1xf32> to vector<2x3xf32>
    %294 = arith.subf %288, %293 : vector<2x3xf32>
    %c0_59 = arith.constant 0 : index
    %c0_60 = arith.constant 0 : index
    %295 = vector.load %arg2[%c0_59, %c0_60] : memref<2x3xf32, #tpu.memory_space<vmem>>, vector<2x3xf32>
    tpu.vector_store %arg2[%c0_59, %c0_60], %294 {strides = array<i32>} : memref<2x3xf32, #tpu.memory_space<vmem>>, vector<2x3xf32>,
    %296 = arith.mulf %3, %294 : vector<2x3xf32>
    %297 = vector.shape_cast %296 : vector<2x3xf32> to vector<1x2x3xf32>
    %cst_61 = arith.constant dense<0.000000e+00> : vector<1xf32>
    %298 = vector.multi_reduction <add>, %297, %cst_61 [1, 2] : vector<1x2x3xf32> to vector<1xf32>
    %299 = vector.shape_cast %298 : vector<1xf32> to vector<1x1x1xf32>
    %300 = vector.extract %299[0, 0, 0] : f32 from vector<1x1x1xf32>
    %301 = vector.broadcast %300 : f32 to vector<1x1xf32>
    %cst_62 = arith.constant 0.000000e+00 : f32
    %302 = vector.broadcast %cst_62 : f32 to vector<1x1xf32>
    %303 = arith.subf %302, %301 : vector<1x1xf32>
    %cst_63 = arith.constant 5.000000e-01 : f32
    %304 = vector.broadcast %cst_63 : f32 to vector<1x1xf32>
    %305 = arith.mulf %303, %304 : vector<1x1xf32>
    %c0_64 = arith.constant 0 : index
    %c0_65 = arith.constant 0 : index
    %306 = vector.load %arg3[%c0_64, %c0_65] : memref<1x1xf32, #tpu.memory_space<vmem>>, vector<1x1xf32>
    tpu.vector_store %arg3[%c0_64, %c0_65], %305 {strides = array<i32>} : memref<1x1xf32, #tpu.memory_space<vmem>>, vector<1x1xf32>,
    return
  }
}

</mosaic_0001>

<bundles_post_ra>
// kernel: forward.1
= control target key start
LH: loop header
LB: loop body
LE: loop exit
PB: predicated region body
PF: predicated region fallthrough
CT: control target
= control target key end

     0   :  { %9 = vsyncpa [#allocation4], 0  ;;  %v1956_v3 = vmov 0.0|0.0   ;;  %vm1957_vm0 = vmmov 0   ;;  %v1958_v8 = vmov 0.0   ;;  %vm52_vm1 = vcmask 523264   ;;  %s2373_s0 = inlined_call_operand.vmem [shape: f32[18,96], index: 0, kind: input, shape index: {}]   ;;  %s2374_s1 = inlined_call_operand.vmem [shape: f32[240,96], index: 1, kind: input, shape index: {}]   ;;  %s2375_s2 = inlined_call_operand.hbm [shape: f32[2,3], index: 2, kind: output, shape index: {0}]   ;;  %s2376_s3 = inlined_call_operand.hbm [shape: f32[1,1], index: 3, kind: output, shape index: {1}]  }
   0x1   :  { %v18_v0 = vld [vmem:[%s2374_s1] sm:$0xff]  ;;  %v19_v1 = vld [vmem:[%s2374_s1 + $0x8] sm:$0xff]  ;;  %1768 = vmatprep.subr.bf16.mxu1 %v1956_v3  ;;  %v28_v5 = vld [vmem:[%s2374_s1 + $0x50] sm:$0xff]  ;;  %1631 = vmatprep.mubr.msk.f32.mxu1 %vm1957_vm0, %v1958_v8 }
   0x2   :  { %v27_v2 = vld [vmem:[%s2374_s1 + $0x48] sm:$0xff]  ;;  %v1752_v4 = vpack.c.bf16 %v19_v1, %v18_v0  ;;  %v20_v6 = vld [vmem:[%s2374_s1 + $0x10] sm:$0xff]  ;;  %v21_v7 = vld [vmem:[%s2374_s1 + $0x18] sm:$0xff] }
   0x3   :  { %v2005_v9 = vpack.c.bf16 %v28_v5, %v27_v2  ;;  %v1756_v10 = vpack.c.bf16 %v21_v7, %v20_v6  ;;  %v29_v11 = vld [vmem:[%s2374_s1 + $0x58] sm:$0xff]  ;;  %v30_v12 = vld [vmem:[%s2374_s1 + $0x60] sm:$0xff]  ;;  %v23_v14 = vld [vmem:[%s2374_s1 + $0x28] sm:$0xff] }
   0x4   :  { %v22_v13 = vld [vmem:[%s2374_s1 + $0x20] sm:$0xff]  ;;  %1753 = vmatprep.subr.bf16.mxu0 %v1752_v4  ;;  %v2020_v15 = vpack.c.bf16 %v30_v12, %v29_v11  ;;  %v1513_v17 = vld [vmem:[%s2374_s1 + $0x68] ss:$0 sm:$0xff] }
   0x5   :  { %1770 = vmatpush3.bf16.msra.mxu1 %v2005_v9  ;;  %1755 = vmatpush3.bf16.msra.mxu0 %v1752_v4  ;;  %v2025_v16 = vld [vmem:[%s2373_s0] sm:$0xff]  ;;  %v1760_v18 = vpack.c.bf16 %v23_v14, %v22_v13 }
   0x6   :  { %1771 = vmatprep.subr.bf16.mxu1 %v1956_v3  ;;  %1757 = vmatprep.subr.bf16.mxu0 %v1756_v10 }
   0x7   :  { %10 = vsyncpa [#allocation6], 0  ;;  %v24_v19 = vld [vmem:[%s2374_s1 + $0x30] sm:$0xff]  ;;  %v25_v20 = vld [vmem:[%s2374_s1 + $0x38] sm:$0xff]  ;;  %1620 = vmatprep.mubr.msk.f32.mxu0 %vm52_vm1, %v2025_v16  ;;  %s1959_s13 = smov 64   ;;  %s1960_s18 = smov 96  }
   0x8   :  { %222 = vrot.lane.b32.xlu0 %v1513_v17, %s1959_s13  ;;  %v1764_v21 = vpack.c.bf16 %v25_v20, %v24_v19  ;;  %v2050_v22 = vld [vmem:[%s2373_s0 + $0x8] sm:$0xff]  ;;  %v1509_v28 = vld [vmem:[%s2374_s1 + $0x40] ss:$0 sm:$0xff]  ;;  %s1961_s19 = smov 32   ;;  %v2080_v47 = vsub.f32 1.0, %v2025_v16  ;;  %vm136_vm2 = vcmask 261120  }
   0x9   :  { %1773 = vmatpush3.bf16.msra.mxu1 %v2020_v15  ;;  %1759 = vmatpush3.bf16.msra.mxu0 %v1756_v10  ;;  %vm1134_vm4 = vcmask 779264   ;;  %vm1208_vm5 = vcmask 785408   ;;  %vm1292_vm6 = vcmask 130048   ;;  %vm1443_vm7 = vcmask 17408  }
   0xa   :  { %1761 = vmatprep.subr.bf16.mxu0 %v1760_v18  ;;  %1774 = vmatprep.subr.bf16.mxu1 %v1956_v3  ;;  %v250_v48 = vmul.f32 0.0, %v2080_v47 }
   0xc   :  { %1632 = vmatmul.mubr.f32.vlgmr.msra.gmra.mrb[0].mxu1 %v1958_v8 }
   0xd   :  { %1763 = vmatpush3.bf16.msra.mxu0 %v1760_v18  ;;  %1776 = vmatpush3.bf16.msra.mxu1 %v2005_v9 }
   0xe   :  { %1765 = vmatprep.subr.bf16.mxu0 %v1764_v21  ;;  %1777 = vmatprep.subr.bf16.mxu1 %v1956_v3 }
   0xf   :  { %1642 = vmatprep.mubr.msk.f32.mxu1 %vm1957_vm0, %v1958_v8 }
  0x11   :  { %1767 = vmatpush3.bf16.msra.mxu0 %v1764_v21  ;;  %1779 = vmatpush3.bf16.msra.mxu1 %v2020_v15 }
  0x12   :  { %1780 = vmatprep.subr.bf16.mxu1 %v1956_v3  ;;  %1792 = vmatprep.subr.bf16.mxu0 %v1956_v3 }
  0x14   :  { %1621 = vmatmul.mubr.msk.f32.vlgmr.msra.gmra.mrb[0].mxu0 %vm52_vm1, %v2050_v22 }
  0x15   :  { %1794 = vmatpush3.bf16.msra.mxu0 %v2005_v9  ;;  %1675 = vmatprep.mubr.msk.f32.mxu0 %vm1957_vm0, %v1958_v8 }
  0x16   :  { %1795 = vmatprep.subr.bf16.mxu0 %v1956_v3 }
  0x19   :  { %1797 = vmatpush3.bf16.msra.mxu0 %v2020_v15 }
  0x1a   :  { %1804 = vmatprep.subr.bf16.mxu0 %v1956_v3 }
  0x7a   :  { %v2063_v23 = vpop.permute.xlu0 %222 }
  0xdf   :  { %v206_v24 = vpop.f32.mrb[0].mxu1 }
  0xe0   :  { %v225_v25 = vadd.f32 %v2063_v23, %v206_v24  ;;  %v1633_v26 = vpop.f32.mrb[1].mxu1 }
  0xe2   :  { %227 = vrot.lane.b32.xlu0 %v225_v25, %s1959_s13 }
  0xe7   :  { %v1622_v27 = vpop.f32.mrb[0].mxu0 }
  0xe8   :  { %v2070_v29 = vadd.f32 %v1622_v27, %v1509_v28  ;;  %v125_v30 = vpop.f32.mrb[1].mxu0 }
  0xe9   :  { %v2072_v31 = vadd.f32 %v1509_v28, %v125_v30 }
  0xeb   :  { %v210_v32 = vadd.f32 %v206_v24, %v2072_v31 }
  0xed   :  { %v1512_v33 = vmul.f32 -1.442695, %v210_v32 }
  0xef   :  { %1856 = vpow2.f32 %v1512_v33 }
  0xf9   :  { %v1857_v34 = vpop.eup %1856 }
  0xfa   :  { %v214_v35 = vadd.f32 1.0, %v1857_v34 }
  0xfc   :  { %1858 = vrcp.f32 %v214_v35 }
 0x106   :  { %v1859_v36 = vpop.eup %1858 }
 0x107   :  { %v237_v42 = vsub.f32 1.0, %v1859_v36  ;;  %v243_v44 = vmul.f32 0.0, %v1859_v36 }
 0x154   :  { %v228_v37 = vpop.permute.xlu0 %227 }
 0x155   :  { %v230_v38 = vmul.f32 %v1859_v36, %v228_v37 }
 0x157   :  { %232 = vrot.lane.b32.xlu1 %v230_v38, %s1959_s13 }
 0x1c9   :  { %v233_v39 = vpop.permute.xlu1 %232 }
 0x1ca   :  { %v235_v40 = vadd.f32 %v233_v39, %v2072_v31 }
 0x1cc   :  { %1860 = vtanh.f32 %v235_v40 }
 0x1d6   :  { %v1861_v41 = vpop.eup %1860 }
 0x1d7   :  { %239 = vrot.lane.b32.xlu1 %v1861_v41, %s1960_s18 }
 0x249   :  { %v240_v43 = vpop.permute.xlu1 %239 }
 0x24a   :  { %v242_v45 = vmul.f32 %v240_v43, %v237_v42 }
 0x24c   :  { %v244_v46 = vadd.f32 %v243_v44, %v242_v45 }
 0x24e   :  { %246 = vrot.lane.b32.xlu0 %v244_v46, %s1961_s19 }
 0x2c0   :  { %v247_v49 = vpop.permute.xlu0 %246 }
 0x2c1   :  { %v2084_v50 = vmul.f32 %v247_v49, %v2025_v16 }
 0x2c3   :  { %v251_v51 = vadd.f32 %v250_v48, %v2084_v50 }
 0x2c5   :  { %253 = vrot.lane.b32.xlu1 %v251_v51, %s1959_s13  ;;  %v356_v1 = vrot.slane %v251_v51, 6 }
 0x2c7   :  { %v368_v18 = vmul.f32 %v356_v1, %v2080_v47 }
 0x337   :  { %v254_v52 = vpop.permute.xlu1 %253 }
 0x338   :  { %1643 = vmatmul.mubr.msk.f32.vlgmr.msra.gmra.mrb[2].mxu1 %vm136_vm2, %v254_v52 }
 0x339   :  { %1782 = vmatpush3.bf16.msra.mxu1 %v2005_v9  ;;  %1653 = vmatprep.mubr.msk.f32.mxu1 %vm1957_vm0, %v1958_v8 }
 0x33a   :  { %1783 = vmatprep.subr.bf16.mxu1 %v1956_v3 }
 0x33d   :  { %1785 = vmatpush3.bf16.msra.mxu1 %v2020_v15 }
 0x33e   :  { %1786 = vmatprep.subr.bf16.mxu1 %v1956_v3 }
 0x40b   :  { %v323_v53 = vpop.f32.mrb[2].mxu1 }
 0x40c   :  { %v337_v54 = vadd.f32 %v323_v53, %v2063_v23  ;;  %v1644_v55 = vpop.f32.mrb[3].mxu1  ;;  %v328_v57 = vrot.slane %v323_v53, 6 }
 0x40e   :  { %v339_v56 = vrot.slane %v337_v54, 6  ;;  %v330_v58 = vadd.f32 %v328_v57, %v2072_v31 }
 0x410   :  { %340 = vrot.lane.b32.xlu0 %v339_v56, %s1959_s13  ;;  %v1515_v59 = vmul.f32 -1.442695, %v330_v58 }
 0x412   :  { %1862 = vpow2.f32 %v1515_v59 }
 0x41c   :  { %v1863_v60 = vpop.eup %1862 }
 0x41d   :  { %v334_v61 = vadd.f32 1.0, %v1863_v60 }
 0x41f   :  { %1864 = vrcp.f32 %v334_v61 }
 0x429   :  { %v1865_v62 = vpop.eup %1864 }
 0x42a   :  { %v350_v7 = vsub.f32 1.0, %v1865_v62 }
 0x482   :  { %v341_v63 = vpop.permute.xlu0 %340 }
 0x483   :  { %v343_v0 = vmul.f32 %v1865_v62, %v341_v63 }
 0x485   :  { %345 = vrot.lane.b32.xlu1 %v343_v0, %s1959_s13 }
 0x489   :  { %357 = vrot.lane.b32.xlu1 %v356_v1, %s1960_s18 }
 0x4f7   :  { %v346_v2 = vpop.permute.xlu1 %345 }
 0x4f8   :  { %v348_v4 = vadd.f32 %v346_v2, %v2072_v31 }
 0x4fa   :  { %1866 = vtanh.f32 %v348_v4 }
 0x4fb   :  { %v358_v6 = vpop.permute.xlu1 %357 }
 0x4fc   :  { %v360_v11 = vmul.f32 %v1865_v62, %v358_v6 }
 0x504   :  { %v1867_v5 = vpop.eup %1866 }
 0x505   :  { %352 = vrot.lane.b32.xlu0 %v1867_v5, %s1960_s18 }
 0x577   :  { %v353_v10 = vpop.permute.xlu0 %352 }
 0x578   :  { %v355_v12 = vmul.f32 %v353_v10, %v350_v7 }
 0x57a   :  { %v361_v13 = vadd.f32 %v360_v11, %v355_v12 }
 0x57c   :  { %363 = vrot.lane.b32.xlu0 %v361_v13, %s1961_s19 }
 0x5ee   :  { %v364_v14 = vpop.permute.xlu0 %363 }
 0x5ef   :  { %v2104_v17 = vmul.f32 %v364_v14, %v2025_v16 }
 0x5f1   :  { %v369_v19 = vadd.f32 %v368_v18, %v2104_v17 }
 0x5f3   :  { %v371_v20 = vrot.slane %v369_v19, 2  ;;  %v475_v38 = vrot.slane %v369_v19, 6 }
 0x5f5   :  { %372 = vrot.lane.b32.xlu1 %v371_v20, %s1959_s13  ;;  %v487_v51 = vmul.f32 %v475_v38, %v2080_v47 }
 0x667   :  { %v373_v21 = vpop.permute.xlu1 %372 }
 0x668   :  { %1654 = vmatmul.mubr.msk.f32.vlgmr.msra.gmra.mrb[4].mxu1 %vm136_vm2, %v373_v21 }
 0x669   :  { %1788 = vmatpush3.bf16.msra.mxu1 %v2005_v9  ;;  %1664 = vmatprep.mubr.msk.f32.mxu1 %vm1957_vm0, %v1958_v8 }
 0x66a   :  { %1789 = vmatprep.subr.bf16.mxu1 %v1956_v3 }
 0x66d   :  { %1791 = vmatpush3.bf16.msra.mxu1 %v2020_v15 }
 0x66e   :  { %1798 = vmatprep.subr.bf16.mxu1 %v1956_v3 }
 0x73b   :  { %v442_v24 = vpop.f32.mrb[4].mxu1 }
 0x73c   :  { %v456_v25 = vadd.f32 %v442_v24, %v2063_v23  ;;  %v1655_v26 = vpop.f32.mrb[5].mxu1  ;;  %v447_v28 = vrot.slane %v442_v24, 4 }
 0x73e   :  { %v458_v27 = vrot.slane %v456_v25, 4  ;;  %v449_v30 = vadd.f32 %v447_v28, %v2072_v31 }
 0x740   :  { %459 = vrot.lane.b32.xlu0 %v458_v27, %s1959_s13  ;;  %v1517_v32 = vmul.f32 -1.442695, %v449_v30 }
 0x742   :  { %1868 = vpow2.f32 %v1517_v32 }
 0x74c   :  { %v1869_v33 = vpop.eup %1868 }
 0x74d   :  { %v453_v34 = vadd.f32 1.0, %v1869_v33 }
 0x74f   :  { %1870 = vrcp.f32 %v453_v34 }
 0x759   :  { %v1871_v35 = vpop.eup %1870 }
 0x75a   :  { %v469_v43 = vsub.f32 1.0, %v1871_v35 }
 0x7b2   :  { %v460_v36 = vpop.permute.xlu0 %459 }
 0x7b3   :  { %v462_v37 = vmul.f32 %v1871_v35, %v460_v36 }
 0x7b5   :  { %464 = vrot.lane.b32.xlu1 %v462_v37, %s1959_s13 }
 0x7b9   :  { %476 = vrot.lane.b32.xlu1 %v475_v38, %s1960_s18 }
 0x827   :  { %v465_v39 = vpop.permute.xlu1 %464 }
 0x828   :  { %v467_v40 = vadd.f32 %v465_v39, %v2072_v31 }
 0x82a   :  { %1872 = vtanh.f32 %v467_v40 }
 0x82b   :  { %v477_v42 = vpop.permute.xlu1 %476 }
 0x82c   :  { %v479_v45 = vmul.f32 %v1871_v35, %v477_v42 }
 0x834   :  { %v1873_v41 = vpop.eup %1872 }
 0x835   :  { %471 = vrot.lane.b32.xlu0 %v1873_v41, %s1960_s18 }
 0x8a7   :  { %v472_v44 = vpop.permute.xlu0 %471 }
 0x8a8   :  { %v474_v46 = vmul.f32 %v472_v44, %v469_v43 }
 0x8aa   :  { %v480_v48 = vadd.f32 %v479_v45, %v474_v46  ;;  %v2166_v46 = vsub.f32 1.0, %v2050_v22 }
 0x8ac   :  { %482 = vrot.lane.b32.xlu0 %v480_v48, %s1961_s19 }
 0x91e   :  { %v483_v49 = vpop.permute.xlu0 %482 }
 0x91f   :  { %v2126_v52 = vmul.f32 %v483_v49, %v2025_v16 }
 0x921   :  { %v488_v53 = vadd.f32 %v487_v51, %v2126_v52 }
 0x923   :  { %v490_v54 = vrot.slane %v488_v53, 4  ;;  %v594_v5 = vrot.slane %v488_v53, 6 }
 0x925   :  { %491 = vrot.lane.b32.xlu1 %v490_v54, %s1959_s13  ;;  %v606_v21 = vmul.f32 %v594_v5, %v2080_v47 }
 0x997   :  { %v492_v55 = vpop.permute.xlu1 %491 }
 0x998   :  { %1665 = vmatmul.mubr.msk.f32.vlgmr.msra.gmra.mrb[6].mxu1 %vm136_vm2, %v492_v55 }
 0x999   :  { %1800 = vmatpush3.bf16.msra.mxu1 %v2005_v9  ;;  %1686 = vmatprep.mubr.msk.f32.mxu1 %vm1957_vm0, %v1958_v8 }
 0x99a   :  { %1801 = vmatprep.subr.bf16.mxu1 %v1956_v3 }
 0x99d   :  { %1803 = vmatpush3.bf16.msra.mxu1 %v2020_v15 }
 0x99e   :  { %1810 = vmatprep.subr.bf16.mxu1 %v1956_v3 }
 0xa6b   :  { %v561_v56 = vpop.f32.mrb[6].mxu1 }
 0xa6c   :  { %v575_v57 = vadd.f32 %v561_v56, %v2063_v23  ;;  %v1666_v58 = vpop.f32.mrb[7].mxu1  ;;  %v566_v60 = vrot.slane %v561_v56, 2 }
 0xa6e   :  { %v577_v59 = vrot.slane %v575_v57, 2  ;;  %v568_v61 = vadd.f32 %v566_v60, %v2072_v31 }
 0xa70   :  { %578 = vrot.lane.b32.xlu0 %v577_v59, %s1959_s13  ;;  %v1519_v62 = vmul.f32 -1.442695, %v568_v61 }
 0xa72   :  { %1874 = vpow2.f32 %v1519_v62 }
 0xa7c   :  { %v1875_v63 = vpop.eup %1874 }
 0xa7d   :  { %v572_v0 = vadd.f32 1.0, %v1875_v63 }
 0xa7f   :  { %1876 = vrcp.f32 %v572_v0 }
 0xa89   :  { %v1877_v1 = vpop.eup %1876 }
 0xa8a   :  { %v588_v12 = vsub.f32 1.0, %v1877_v1 }
 0xae2   :  { %v579_v2 = vpop.permute.xlu0 %578 }
 0xae3   :  { %v581_v4 = vmul.f32 %v1877_v1, %v579_v2 }
 0xae5   :  { %583 = vrot.lane.b32.xlu1 %v581_v4, %s1959_s13 }
 0xae9   :  { %595 = vrot.lane.b32.xlu1 %v594_v5, %s1960_s18 }
 0xb57   :  { %v584_v6 = vpop.permute.xlu1 %583 }
 0xb58   :  { %v586_v7 = vadd.f32 %v584_v6, %v2072_v31 }
 0xb5a   :  { %1878 = vtanh.f32 %v586_v7 }
 0xb5b   :  { %v596_v11 = vpop.permute.xlu1 %595 }
 0xb5c   :  { %v598_v14 = vmul.f32 %v1877_v1, %v596_v11 }
 0xb64   :  { %v1879_v10 = vpop.eup %1878 }
 0xb65   :  { %590 = vrot.lane.b32.xlu0 %v1879_v10, %s1960_s18 }
 0xbd7   :  { %v591_v13 = vpop.permute.xlu0 %590 }
 0xbd8   :  { %v593_v18 = vmul.f32 %v591_v13, %v588_v12 }
 0xbda   :  { %v599_v19 = vadd.f32 %v598_v14, %v593_v18 }
 0xbdc   :  { %601 = vrot.lane.b32.xlu0 %v599_v19, %s1961_s19 }
 0xc4e   :  { %v602_v20 = vpop.permute.xlu0 %601 }
 0xc4f   :  { %v2147_v24 = vmul.f32 %v602_v20, %v2025_v16 }
 0xc51   :  { %v607_v31 = vadd.f32 %v606_v21, %v2147_v24 }
 0xc53   :  { %v609_v25 = vrot.slane %v607_v31, 6 }
 0xc55   :  { %610 = vrot.lane.b32.xlu1 %v609_v25, %s1959_s13  ;;  %v720_v51 = vmul.f32 %v609_v25, %v2166_v46 }
 0xcc7   :  { %v611_v26 = vpop.permute.xlu1 %610 }
 0xcc8   :  { %1676 = vmatmul.mubr.msk.f32.vlgmr.msra.gmra.mrb[2].mxu0 %vm136_vm2, %v611_v26 }
 0xcc9   :  { %1806 = vmatpush3.bf16.msra.mxu0 %v2005_v9  ;;  %1697 = vmatprep.mubr.msk.f32.mxu0 %vm1957_vm0, %v1958_v8 }
 0xcca   :  { %1807 = vmatprep.subr.bf16.mxu0 %v1956_v3 }
 0xccd   :  { %1809 = vmatpush3.bf16.msra.mxu0 %v2020_v15 }
 0xd9b   :  { %v680_v47 = vpop.f32.mrb[2].mxu0 }
 0xd9c   :  { %v691_v16 = vadd.f32 %v680_v47, %v2063_v23  ;;  %v1677_v27 = vpop.f32.mrb[3].mxu0  ;;  %v684_v28 = vadd.f32 %v680_v47, %v2070_v29 }
 0xd9e   :  { %693 = vrot.lane.b32.xlu0 %v691_v16, %s1959_s13  ;;  %v1521_v30 = vmul.f32 -1.442695, %v684_v28 }
 0xda0   :  { %1880 = vpow2.f32 %v1521_v30 }
 0xdaa   :  { %v1881_v32 = vpop.eup %1880 }
 0xdab   :  { %v688_v33 = vadd.f32 1.0, %v1881_v32 }
 0xdad   :  { %1882 = vrcp.f32 %v688_v33 }
 0xdb7   :  { %v1883_v34 = vpop.eup %1882 }
 0xdb8   :  { %v703_v41 = vsub.f32 1.0, %v1883_v34 }
 0xe10   :  { %v694_v35 = vpop.permute.xlu0 %693 }
 0xe11   :  { %v696_v36 = vmul.f32 %v1883_v34, %v694_v35 }
 0xe13   :  { %698 = vrot.lane.b32.xlu1 %v696_v36, %s1959_s13 }
 0xe17   :  { %709 = vrot.lane.b32.xlu1 %v609_v25, %s1960_s18 }
 0xe85   :  { %v699_v37 = vpop.permute.xlu1 %698 }
 0xe86   :  { %v701_v38 = vadd.f32 %v699_v37, %v2070_v29 }
 0xe88   :  { %1884 = vtanh.f32 %v701_v38 }
 0xe89   :  { %v710_v40 = vpop.permute.xlu1 %709 }
 0xe8a   :  { %v712_v43 = vmul.f32 %v1883_v34, %v710_v40 }
 0xe92   :  { %v1885_v39 = vpop.eup %1884 }
 0xe93   :  { %705 = vrot.lane.b32.xlu0 %v1885_v39, %s1960_s18 }
 0xf05   :  { %v706_v42 = vpop.permute.xlu0 %705 }
 0xf06   :  { %v708_v44 = vmul.f32 %v706_v42, %v703_v41 }
 0xf08   :  { %v713_v45 = vadd.f32 %v712_v43, %v708_v44 }
 0xf0a   :  { %715 = vrot.lane.b32.xlu0 %v713_v45, %s1961_s19 }
 0xf7c   :  { %v716_v48 = vpop.permute.xlu0 %715 }
 0xf7d   :  { %v2169_v49 = vmul.f32 %v716_v48, %v2050_v22 }
 0xf7f   :  { %v721_v53 = vadd.f32 %v720_v51, %v2169_v49 }
 0xf81   :  { %723 = vrot.lane.b32.xlu1 %v721_v53, %s1959_s13  ;;  %v826_v1 = vrot.slane %v721_v53, 6 }
 0xf83   :  { %v838_v18 = vmul.f32 %v826_v1, %v2166_v46 }
 0xff3   :  { %v724_v54 = vpop.permute.xlu1 %723 }
 0xff4   :  { %1687 = vmatmul.mubr.msk.f32.vlgmr.msra.gmra.mrb[8].mxu1 %vm136_vm2, %v724_v54 }
 0xff5   :  { %1812 = vmatpush3.bf16.msra.mxu1 %v2005_v9  ;;  %1708 = vmatprep.mubr.msk.f32.mxu1 %vm1957_vm0, %v1958_v8 }
 0xff6   :  { %1813 = vmatprep.subr.bf16.mxu1 %v1956_v3 }
 0xff9   :  { %1815 = vmatpush3.bf16.msra.mxu1 %v2020_v15 }
 0xffa   :  { %1840 = vmatprep.subr.bf16.mxu1 %v1956_v3 }
0x10c7   :  { %v793_v55 = vpop.f32.mrb[8].mxu1 }
0x10c8   :  { %v807_v56 = vadd.f32 %v793_v55, %v2063_v23  ;;  %v1688_v57 = vpop.f32.mrb[9].mxu1  ;;  %v798_v59 = vrot.slane %v793_v55, 6 }
0x10ca   :  { %v809_v58 = vrot.slane %v807_v56, 6  ;;  %v800_v60 = vadd.f32 %v798_v59, %v2070_v29 }
0x10cc   :  { %810 = vrot.lane.b32.xlu0 %v809_v58, %s1959_s13  ;;  %v1523_v9 = vmul.f32 -1.442695, %v800_v60 }
0x10ce   :  { %1886 = vpow2.f32 %v1523_v9 }
0x10d8   :  { %v1887_v61 = vpop.eup %1886 }
0x10d9   :  { %v804_v62 = vadd.f32 1.0, %v1887_v61 }
0x10db   :  { %1888 = vrcp.f32 %v804_v62 }
0x10e5   :  { %v1889_v63 = vpop.eup %1888 }
0x10e6   :  { %v820_v7 = vsub.f32 1.0, %v1889_v63 }
0x113e   :  { %v811_v0 = vpop.permute.xlu0 %810 }
0x113f   :  { %v813_v15 = vmul.f32 %v1889_v63, %v811_v0 }
0x1141   :  { %815 = vrot.lane.b32.xlu1 %v813_v15, %s1959_s13 }
0x1145   :  { %827 = vrot.lane.b32.xlu1 %v826_v1, %s1960_s18 }
0x11b3   :  { %v816_v2 = vpop.permute.xlu1 %815 }
0x11b4   :  { %v818_v4 = vadd.f32 %v816_v2, %v2070_v29 }
0x11b6   :  { %1890 = vtanh.f32 %v818_v4 }
0x11b7   :  { %v828_v6 = vpop.permute.xlu1 %827 }
0x11b8   :  { %v830_v11 = vmul.f32 %v1889_v63, %v828_v6  ;;  %v1111_v6 = vrot.slane %v2147_v24, 6 }
0x11c0   :  { %v1891_v5 = vpop.eup %1890 }
0x11c1   :  { %822 = vrot.lane.b32.xlu0 %v1891_v5, %s1960_s18  ;;  %v1100_v5 = vrot.slane %v2126_v52, 4 }
0x1233   :  { %v823_v10 = vpop.permute.xlu0 %822 }
0x1234   :  { %v825_v12 = vmul.f32 %v823_v10, %v820_v7 }
0x1236   :  { %v831_v13 = vadd.f32 %v830_v11, %v825_v12 }
0x1238   :  { %833 = vrot.lane.b32.xlu0 %v831_v13, %s1961_s19 }
0x12aa   :  { %v834_v14 = vpop.permute.xlu0 %833 }
0x12ab   :  { %v2191_v19 = vmul.f32 %v834_v14, %v2050_v22 }
0x12ad   :  { %v839_v20 = vadd.f32 %v838_v18, %v2191_v19  ;;  %v1105_v24 = vrot.slane %v2191_v19, 2 }
0x12af   :  { %v841_v21 = vrot.slane %v839_v20, 2  ;;  %v945_v37 = vrot.slane %v839_v20, 6 }
0x12b1   :  { %842 = vrot.lane.b32.xlu1 %v841_v21, %s1959_s13  ;;  %v957_v53 = vmul.f32 %v945_v37, %v2166_v46  ;;  %v1075_v21 = vlaneseq }
0x1323   :  { %v843_v31 = vpop.permute.xlu1 %842 }
0x1324   :  { %1698 = vmatmul.mubr.msk.f32.vlgmr.msra.gmra.mrb[4].mxu0 %vm136_vm2, %v843_v31 }
0x13f7   :  { %v912_v25 = vpop.f32.mrb[4].mxu0 }
0x13f8   :  { %v926_v26 = vadd.f32 %v912_v25, %v2063_v23  ;;  %v1699_v47 = vpop.f32.mrb[5].mxu0  ;;  %v917_v27 = vrot.slane %v912_v25, 4 }
0x13fa   :  { %v928_v16 = vrot.slane %v926_v26, 4  ;;  %v919_v28 = vadd.f32 %v917_v27, %v2070_v29 }
0x13fc   :  { %929 = vrot.lane.b32.xlu0 %v928_v16, %s1959_s13  ;;  %v1525_v30 = vmul.f32 -1.442695, %v919_v28  ;;  %v1076_v16 = vand.u32 127, %v1075_v21 }
0x13fe   :  { %1892 = vpow2.f32 %v1525_v30  ;;  %vm1077_vm3 = vcmp.lt.s32.totalorder %v1076_v16, 16  ;;  %v32_v30 = vld [vmem:[%s2374_s1 + $0x70] sm:$0xff] }
0x1408   :  { %v1893_v32 = vpop.eup %1892 }
0x1409   :  { %v923_v33 = vadd.f32 1.0, %v1893_v32 }
0x140b   :  { %1894 = vrcp.f32 %v923_v33  ;;  %v34_v33 = vld [vmem:[%s2374_s1 + $0x80] sm:$0xff] }
0x1415   :  { %v1895_v34 = vpop.eup %1894 }
0x1416   :  { %v939_v42 = vsub.f32 1.0, %v1895_v34 }
0x146e   :  { %v930_v35 = vpop.permute.xlu0 %929 }
0x146f   :  { %v932_v36 = vmul.f32 %v1895_v34, %v930_v35 }
0x1471   :  { %934 = vrot.lane.b32.xlu1 %v932_v36, %s1959_s13 }
0x1475   :  { %946 = vrot.lane.b32.xlu1 %v945_v37, %s1960_s18  ;;  %v36_v37 = vld [vmem:[%s2374_s1 + $0x90] sm:$0xff] }
0x14e3   :  { %v935_v38 = vpop.permute.xlu1 %934 }
0x14e4   :  { %v937_v39 = vadd.f32 %v935_v38, %v2070_v29  ;;  %v37_v38 = vld [vmem:[%s2374_s1 + $0x98] sm:$0xff] }
0x14e6   :  { %1896 = vtanh.f32 %v937_v39 }
0x14e7   :  { %v947_v41 = vpop.permute.xlu1 %946 }
0x14e8   :  { %v949_v44 = vmul.f32 %v1895_v34, %v947_v41  ;;  %v35_v34 = vld [vmem:[%s2374_s1 + $0x88] sm:$0xff]  ;;  %v1824_v41 = vpack.c.bf16 %v37_v38, %v36_v37  ;;  %v17_v38 = vld [vmem:[%s2373_s0 + $0x10] sm:$0x3]  ;;  %s1962_s0 = smov [#allocation3]  }
0x14e9   :  { %v1820_v36 = vpack.c.bf16 %v35_v34, %v34_v33 }
0x14f0   :  { %v1897_v40 = vpop.eup %1896 }
0x14f1   :  { %941 = vrot.lane.b32.xlu0 %v1897_v40, %s1960_s18 }
0x1563   :  { %v942_v43 = vpop.permute.xlu0 %941 }
0x1564   :  { %v944_v45 = vmul.f32 %v942_v43, %v939_v42  ;;  %v38_v43 = vld [vmem:[%s2374_s1 + $0xa0] sm:$0xff] }
0x1566   :  { %v950_v48 = vadd.f32 %v949_v44, %v944_v45  ;;  %v39_v44 = vld [vmem:[%s2374_s1 + $0xa8] sm:$0xff] }
0x1567   :  { %v1828_v45 = vpack.c.bf16 %v39_v44, %v38_v43 }
0x1568   :  { %952 = vrot.lane.b32.xlu0 %v950_v48, %s1961_s19 }
0x15da   :  { %v953_v51 = vpop.permute.xlu0 %952 }
0x15db   :  { %v955_v54 = vmul.f32 %v953_v51, %v2050_v22  ;;  %v40_v51 = vld [vmem:[%s2374_s1 + $0xb0] sm:$0xff] }
0x15dd   :  { %v958_v55 = vadd.f32 %v957_v53, %v955_v54  ;;  %v1094_v52 = vrot.slane %v955_v54, 4  ;;  %v41_v53 = vld [vmem:[%s2374_s1 + $0xb8] sm:$0xff] }
0x15de   :  { %v1832_v54 = vpack.c.bf16 %v41_v53, %v40_v51 }
0x15df   :  { %v960_v56 = vrot.slane %v958_v55, 4  ;;  %v1064_v4 = vrot.slane %v958_v55, 6 }
0x15e1   :  { %961 = vrot.lane.b32.xlu1 %v960_v56, %s1959_s13  ;;  %v42_v56 = vld [vmem:[%s2374_s1 + $0xc0] sm:$0xff] }
0x1653   :  { %v962_v57 = vpop.permute.xlu1 %961 }
0x1654   :  { %1709 = vmatmul.mubr.msk.f32.vlgmr.msra.gmra.mrb[10].mxu1 %vm136_vm2, %v962_v57  ;;  %v43_v57 = vld [vmem:[%s2374_s1 + $0xc8] sm:$0xff] }
0x1655   :  { %1742 = vmatprep.mubr.msk.f32.mxu1 %vm1957_vm0, %v1958_v8 }
0x1727   :  { %v1031_v58 = vpop.f32.mrb[10].mxu1 }
0x1728   :  { %v1045_v59 = vadd.f32 %v1031_v58, %v2063_v23  ;;  %v1710_v60 = vpop.f32.mrb[11].mxu1  ;;  %v1036_v46 = vrot.slane %v1031_v58, 2  ;;  %v1089_v23 = vrot.slane %v2104_v17, 2  ;;  %v1836_v58 = vpack.c.bf16 %v43_v57, %v42_v56 }
0x172a   :  { %v1047_v9 = vrot.slane %v1045_v59, 2  ;;  %v1038_v61 = vadd.f32 %v1036_v46, %v2070_v29 }
0x172c   :  { %1048 = vrot.lane.b32.xlu0 %v1047_v9, %s1959_s13  ;;  %v1527_v62 = vmul.f32 -1.442695, %v1038_v61 }
0x172e   :  { %1898 = vpow2.f32 %v1527_v62 }
0x1738   :  { %v1899_v63 = vpop.eup %1898 }
0x1739   :  { %v1042_v0 = vadd.f32 1.0, %v1899_v63 }
0x173b   :  { %1900 = vrcp.f32 %v1042_v0 }
0x1745   :  { %v1901_v15 = vpop.eup %1900 }
0x1746   :  { %v1058_v12 = vsub.f32 1.0, %v1901_v15 }
0x179e   :  { %v1049_v1 = vpop.permute.xlu0 %1048 }
0x179f   :  { %v1051_v2 = vmul.f32 %v1901_v15, %v1049_v1 }
0x17a1   :  { %1053 = vrot.lane.b32.xlu1 %v1051_v2, %s1959_s13 }
0x17a5   :  { %1065 = vrot.lane.b32.xlu1 %v1064_v4, %s1960_s18 }
0x17a9   :  { %1079 = vrot.lane.b32.xlu1 %v2084_v50, %s1959_s13 }
0x17ad   :  { %1090 = vrot.lane.b32.xlu1 %v1089_v23, %s1959_s13 }
0x17b1   :  { %1101 = vrot.lane.b32.xlu1 %v1100_v5, %s1959_s13 }
0x17b5   :  { %1112 = vrot.lane.b32.xlu1 %v1111_v6, %s1959_s13 }
0x1813   :  { %v1054_v7 = vpop.permute.xlu1 %1053 }
0x1814   :  { %v1056_v10 = vadd.f32 %v1054_v7, %v2070_v29 }
0x1816   :  { %1902 = vtanh.f32 %v1056_v10 }
0x1817   :  { %v1066_v50 = vpop.permute.xlu1 %1065 }
0x1818   :  { %v1068_v13 = vmul.f32 %v1901_v15, %v1066_v50 }
0x181b   :  { %v2229_v29 = vpop.permute.xlu1 %1079 }
0x181f   :  { %v1091_v25 = vpop.permute.xlu1 %1090 }
0x1820   :  { %v1903_v11 = vpop.eup %1902 }
0x1821   :  { %1060 = vrot.lane.b32.xlu0 %v1903_v11, %s1960_s18 }
0x1823   :  { %v1102_v27 = vpop.permute.xlu1 %1101 }
0x1827   :  { %v1113_v39 = vpop.permute.xlu1 %1112 }
0x1893   :  { %v1061_v17 = vpop.permute.xlu0 %1060 }
0x1894   :  { %v1063_v14 = vmul.f32 %v1061_v17, %v1058_v12 }
0x1896   :  { %v1069_v18 = vadd.f32 %v1068_v13, %v1063_v14 }
0x1898   :  { %1071 = vrot.lane.b32.xlu0 %v1069_v18, %s1961_s19 }
0x189c   :  { %1095 = vrot.lane.b32.xlu0 %v1094_v52, %s1959_s13 }
0x18a0   :  { %1106 = vrot.lane.b32.xlu0 %v1105_v24, %s1959_s13 }
0x190a   :  { %v1072_v20 = vpop.permute.xlu0 %1071 }
0x190b   :  { %v1074_v31 = vmul.f32 %v1072_v20, %v2050_v22 }
0x190d   :  { %v1083_v26 = vrot.slane %v1074_v31, 6 }
0x190e   :  { %v1096_v47 = vpop.permute.xlu0 %1095 }
0x190f   :  { %1084 = vrot.lane.b32.xlu0 %v1083_v26, %s1959_s13  ;;  %v1098_v22 = vsel %vm1077_vm3, %v1091_v25, %v1096_v47  ;;  %v1122_v55 = vsel %vm1077_vm3, %v1096_v47, %v1091_v25 }
0x1912   :  { %v1107_v28 = vpop.permute.xlu0 %1106 }
0x1913   :  { %1116 = vrot.lane.b32.xlu0 %v2169_v49, %s1959_s13  ;;  %v2236_v19 = vsel %vm1077_vm3, %v1102_v27, %v1107_v28  ;;  %v33_v49 = vld [vmem:[%s2374_s1 + $0x78] sm:$0xff]  ;;  %v1121_v59 = vsel %vm1077_vm3, %v1107_v28, %v1102_v27 }
0x1914   :  { %1146 = vrot.lane.b32.xlu1 %v2236_v19, %s1961_s19  ;;  %v1816_v32 = vpack.c.bf16 %v33_v49, %v32_v30 }
0x1916   :  { %1817 = vmatprep.subr.bf16.mxu0 %v1816_v32 }
0x1917   :  { %1136 = vrot.lane.b32.xlu0 %v1098_v22, %s1961_s19  ;;  %1819 = vmatpush3.bf16.msra.mxu0 %v1816_v32 }
0x1918   :  { %1129 = vrot.lane.b32.xlu1 %v1098_v22, %s1959_s13  ;;  %1821 = vmatprep.subr.bf16.mxu0 %v1820_v36 }
0x191b   :  { %1823 = vmatpush3.bf16.msra.mxu0 %v1820_v36  ;;  %v46_v36 = vld [vmem:[%s2374_s1 + $0xe0] sm:$0xff] }
0x191c   :  { %1825 = vmatprep.subr.bf16.mxu0 %v1824_v41 }
0x191f   :  { %1827 = vmatpush3.bf16.msra.mxu0 %v1824_v41 }
0x1920   :  { %1829 = vmatprep.subr.bf16.mxu0 %v1828_v45 }
0x1923   :  { %1831 = vmatpush3.bf16.msra.mxu0 %v1828_v45 }
0x1924   :  { %1833 = vmatprep.subr.bf16.mxu0 %v1832_v54 }
0x1927   :  { %1835 = vmatpush3.bf16.msra.mxu0 %v1832_v54 }
0x1928   :  { %1837 = vmatprep.subr.bf16.mxu0 %v1836_v58 }
0x192b   :  { %1839 = vmatpush3.bf16.msra.mxu0 %v1836_v58 }
0x1981   :  { %v1085_v35 = vpop.permute.xlu0 %1084 }
0x1982   :  { %v1087_v60 = vsel %vm1077_vm3, %v2229_v29, %v1085_v35  ;;  %v1123_v9 = vsel %vm1077_vm3, %v1085_v35, %v2229_v29  ;;  %v45_v35 = vld [vmem:[%s2374_s1 + $0xd8] sm:$0xff] }
0x1985   :  { %v1117_v40 = vpop.permute.xlu0 %1116 }
0x1986   :  { %v1119_v42 = vsel %vm1077_vm3, %v1113_v39, %v1117_v40  ;;  %v1120_v48 = vsel %vm1077_vm3, %v1117_v40, %v1113_v39  ;;  %v1147_v46 = vpop.permute.xlu1 %1146  ;;  %v1844_v39 = vpack.c.bf16 %v46_v36, %v45_v35 }
0x1987   :  { %1150 = vrot.lane.b32.xlu1 %v1119_v42, %s1959_s13  ;;  %1156 = vrot.lane.b32.xlu0 %v1119_v42, %s1961_s19  ;;  %v1153_v63 = vsel %vm136_vm2, %v1098_v22, %v1147_v46 }
0x1989   :  { %v1137_v61 = vpop.permute.xlu0 %1136 }
0x198a   :  { %v1130_v62 = vpop.permute.xlu1 %1129  ;;  %v1143_v2 = vsel %vm136_vm2, %v1087_v60, %v1137_v61 }
0x198b   :  { %1166 = vrot.lane.b32.xlu1 %v1120_v48, %s1961_s19  ;;  %1140 = vrot.lane.b32.xlu0 %v2236_v19, %s1959_s13 }
0x198f   :  { %1186 = vrot.lane.b32.xlu1 %v1122_v55, %s1961_s19  ;;  %1160 = vrot.lane.b32.xlu0 %v1120_v48, %s1959_s13 }
0x1993   :  { %1170 = vrot.lane.b32.xlu1 %v1121_v59, %s1959_s13  ;;  %1176 = vrot.lane.b32.xlu0 %v1121_v59, %s1961_s19 }
0x1997   :  { %1125 = vrot.lane.b32.xlu1 %v1087_v60, %s1961_s19  ;;  %1196 = vrot.lane.b32.xlu0 %v1123_v9, %s1961_s19 }
0x199b   :  { %1190 = vrot.lane.b32.xlu1 %v1123_v9, %s1959_s13  ;;  %1180 = vrot.lane.b32.xlu0 %v1122_v55, %s1959_s13 }
0x19f9   :  { %v1157_v0 = vpop.permute.xlu0 %1156  ;;  %v1151_v15 = vpop.permute.xlu1 %1150 }
0x19fa   :  { %v1154_v1 = vsel %vm52_vm1, %v1153_v63, %v1151_v15  ;;  %v1163_v6 = vsel %vm136_vm2, %v2236_v19, %v1157_v0  ;;  %v1528_v19 = vld [vmem:[%s2374_s1 + $0xd0] ss:$0 sm:$0xff] }
0x19fb   :  { %1155 = vst.msk [vmem:[#allocation2 + $0x4] sm:$0x3] %vm1134_vm4, %v1154_v1 }
0x19fd   :  { %v1141_v4 = vpop.permute.xlu0 %1140  ;;  %v1167_v23 = vpop.permute.xlu1 %1166 }
0x19fe   :  { %v1144_v5 = vsel %vm52_vm1, %v1143_v2, %v1141_v4  ;;  %v1173_v50 = vsel %vm136_vm2, %v1119_v42, %v1167_v23  ;;  %v1532_v42 = vld [vmem:[%s2374_s1 + $0xe8] ss:$0 sm:$0xff]  ;;  %s1487_s1 = sshll.u32 %s1962_s0, 4  ;;  %s1488_s1 = int_to_ptr.vmem [resolvable:$true] %s1487_s1 }
0x19ff   :  { %1145 = vst.msk [vmem:[#allocation2 + $0x2] sm:$0x3] %vm1134_vm4, %v1144_v5  ;;  %s1908_s28 = scalar_lea.vmem %s1488_s1, 32  ;;  %p1913_p1 = scmp.lt.s32.totalorder %s1488_s1, %s1488_s1 }
0x1a00   :  { %p1909_p0 = scmp.ne.s32.totalorder %s1488_s1, %s1908_s28  ;;  %p1914_p2 = scmp.lt.s32.totalorder %s1908_s28, %s1908_s28 }
0x1a01   :  { %v1161_v7 = vpop.permute.xlu0 %1160  ;;  %v1187_v10 = vpop.permute.xlu1 %1186 }
0x1a02   :  { %v1164_v11 = vsel %vm52_vm1, %v1163_v6, %v1161_v7  ;;  %v1193_v21 = vsel %vm136_vm2, %v1121_v59, %v1187_v10  ;;  %p1915_p3 = por %p1914_p2, %p1913_p1 }
0x1a03   :  { %1165 = vst.msk [vmem:[#allocation2 + $0x6] sm:$0x3] %vm1134_vm4, %v1164_v11 }
0x1a04   :  { %p1916_p4 = pnand %p1915_p3, %p1909_p0 }
0x1a05   :  { %v1177_v12 = vpop.permute.xlu0 %1176  ;;  %v1171_v17 = vpop.permute.xlu1 %1170 }
0x1a06   :  { %v1174_v13 = vsel %vm52_vm1, %v1173_v50, %v1171_v17  ;;  %v1183_v31 = vsel %vm136_vm2, %v1120_v48, %v1177_v12 }
0x1a07   :  { %1175 = vst.msk [vmem:[#allocation2 + $0x8] sm:$0x3] %vm1134_vm4, %v1174_v13 }
0x1a09   :  { %v1197_v14 = vpop.permute.xlu0 %1196  ;;  %v1126_v18 = vpop.permute.xlu1 %1125 }
0x1a0a   :  { %v1199_v52 = vsel %vm136_vm2, %v1122_v55, %v1197_v14  ;;  %v1132_v24 = vsel %vm136_vm2, 0.0, %v1126_v18 }
0x1a0b   :  { %v1200_v29 = vsel %vm52_vm1, %v1199_v52, 0.0  ;;  %v1133_v20 = vsel %vm52_vm1, %v1132_v24, %v1130_v62 }
0x1a0c   :  { %1201 = vst.msk [vmem:[#allocation2 + $0xe] sm:$0x3] %vm1134_vm4, %v1200_v29  ;;  %1135 = vst.msk [vmem:[#allocation2] sm:$0x3] %vm1134_vm4, %v1133_v20 }
0x1a0d   :  { %v1181_v25 = vpop.permute.xlu0 %1180  ;;  %v1191_v26 = vpop.permute.xlu1 %1190 }
0x1a0e   :  { %v1184_v47 = vsel %vm52_vm1, %v1183_v31, %v1181_v25  ;;  %v1194_v16 = vsel %vm52_vm1, %v1193_v21, %v1191_v26 }
0x1a0f   :  { %1185 = vst.msk [vmem:[#allocation2 + $0xa] sm:$0x3] %vm1134_vm4, %v1184_v47  ;;  %1195 = vst.msk [vmem:[#allocation2 + $0xc] sm:$0x3] %vm1134_vm4, %v1194_v16 }
0x1a13   :  { %v1202_v27 = vld [vmem:[#allocation2] sm:$0xff] }
0x1a14   :  { %1735 = vmatprep.mubr.msk.f32.mxu0 %vm1208_vm5, %v1202_v27 }
0x1a16   :  { %v1203_v28 = vld [vmem:[#allocation2 + $0x8] sm:$0xff] }
0x1a17   :  { %1736 = vmatmul.mubr.msk.f32.vlgmr.msra.gmra.mrb[6].mxu0 %vm1208_vm5, %v1203_v28 }
0x1aea   :  { %v1737_v22 = vpop.f32.mrb[6].mxu0 }
0x1aeb   :  { %v1287_v30 = vadd.f32 %v1737_v22, %v1528_v19  ;;  %v1281_v49 = vpop.f32.mrb[7].mxu0 }
0x1aec   :  { %v1282_v32 = vadd.f32 %v1528_v19, %v1281_v49 }
0x1aed   :  { %v1291_v33 = vmax.f32 %v1287_v30, 0.0 }
0x1aee   :  { %v1290_v34 = vmax.f32 %v1282_v32, 0.0 }
0x1af0   :  { %v1841_v37 = vpack.c.bf16 %v1291_v33, %v1290_v34 }
0x1af2   :  { %1842 = vmatpush3.bf16.msra.mxu1 %v1841_v37 }
0x1af3   :  { %1843 = vmatprep.subr.bf16.mxu1 %v1956_v3 }
0x1af5   :  { %1743 = vmatmul.mubr.msk.f32.vlgmr.msra.gmra.mrb[12].mxu1 %vm1292_vm6, %v17_v38 }
0x1af6   :  { %1845 = vmatpush3.bf16.msra.mxu1 %v1844_v39  ;;  %1749 = vmatprep.mubr.msk.f32.mxu1 %vm1957_vm0, %v1958_v8 }
0x1bc8   :  { %v1362_v40 = vpop.f32.mrb[12].mxu1 }
0x1bc9   :  { %v1744_v41 = vpop.f32.mrb[13].mxu1  ;;  %1750 = vmatmul.mubr.msk.f32.vlgmr.msra.gmra.mrb[14].mxu1 %vm1292_vm6, %v1362_v40 }
0x1c9c   :  { %v1439_v43 = vpop.f32.mrb[14].mxu1 }
0x1c9d   :  { %v1440_v44 = vadd.f32 %v1532_v42, %v1439_v43  ;;  %v1751_v45 = vpop.f32.mrb[15].mxu1 }
0x1c9f   :  { %v1444_v48 = vsel %vm1443_vm7, %v1440_v44, -inf }
0x1ca0   :  { %1445 = vmax.xlane.f32.xlu0 %v1444_v48 }
0x1d2d   :  { %v1446_v3 = vpop.xlane.xlu0 %1445 }
0x1d2e   :  { %v1447_v51 = vsub.f32 %v1440_v44, %v1446_v3 }
0x1d30   :  { %v1448_v53 = vmul.f32 1.442695, %v1447_v51 }
0x1d32   :  { %1904 = vpow2.f32 %v1448_v53 }
0x1d3c   :  { %v1905_v54 = vpop.eup %1904 }
0x1d3d   :  { %v1450_v8 = vsel %vm1443_vm7, %v1905_v54, 0.0 }
0x1d3e   :  { %1451 = vadd.xlane.f32.xlu1 %v1450_v8 }
0x1dcb   :  { %v1452_v55 = vpop.xlane.xlu1 %1451 }
0x1dcc   :  { %1906 = vlog2.f32 %v1452_v55 }
0x1dd6   :  { %v1907_v56 = vpop.eup %1906 }
0x1dd7   :  { %v1454_v57 = vmul.f32 0.6931472, %v1907_v56 }
0x1dd9   :  { %v1455_v58 = vsub.f32 %v1447_v51, %v1454_v57 }
0x1ddb   :  { %1458 = vrot.lane.b32.xlu0 %v1455_v58, %s1959_s13  ;;  %1456 = vst.msk [vmem:[#allocation3] sm:$0x3] %vm1443_vm7, %v1455_v58 }
0x1e4d   :  { %v1459_v59 = vpop.permute.xlu0 %1458 }
0x1e4e   :  { %v1461_v60 = vmul.f32 %v1459_v59, %v17_v38 }
0x1e50   :  { %1463 = vrot.lane.b32.xlu1 %v1461_v60, %s1959_s13 }
0x1ec2   :  { %v1464_v9 = vpop.permute.xlu1 %1463 }
0x1ec3   :  { %v1466_v46 = vsel %vm1443_vm7, %v1464_v9, 0.0 }
0x1ec4   :  { %1467 = vadd.xlane.f32.xlu0 %v1466_v46 }
0x1ec5   :  { %1919 = shalt.err (!%p1916_p4)
}
0x1ec6   :  { %s1920_s4 = scalar_lea.hbm %s2375_s2, 32 }
0x1ec7   :  { %p1921_p5 = scmp.ne.s32.totalorder %s2375_s2, %s1920_s4  ;;  %p1924_p6 = scmp.lt.u32.totalorder %s1920_s4, %s2375_s2 }
0x1ec9   :  { %p1926_p7 = pnand %p1924_p6, %p1921_p5 }
0x1ecb   :  { %1929 = shalt.err (!%p1926_p7)
}
0x1ecc   :  { %1490 = dma.vmem_to_hbm [thread:$0]  %s1488_s1, 32, %s2375_s2, [#allocation4]   ;;  %vm1479_vm8 = vcmask 0  }
0x1ecd   :  { %s1963_s11 = smov [#allocation5]  }
0x1ece   :  { %s1497_s12 = sshll.u32 %s1963_s11, 4  ;;  %s1498_s12 = int_to_ptr.vmem [resolvable:$true] %s1497_s12 }
0x1ecf   :  { %s1930_s14 = scalar_lea.vmem %s1498_s12, 16  ;;  %s1934_s2 = scalar_lea.vmem %s1498_s12, 32 }
0x1ed0   :  { %p1931_p8 = scmp.ne.s32.totalorder %s1498_s12, %s1930_s14  ;;  %p1935_p9 = scmp.lt.s32.totalorder %s1498_s12, %s1498_s12 }
0x1ed1   :  { %p1936_p10 = scmp.lt.s32.totalorder %s1934_s2, %s1930_s14 }
0x1ed3   :  { %p1937_p11 = por %p1936_p10, %p1935_p9 }
0x1ed5   :  { %p1938_p12 = pnand %p1937_p11, %p1931_p8 }
0x1f51   :  { %v1468_v61 = vpop.xlane.xlu0 %1467 }
0x1f52   :  { %v1469_v62 = vrot.slane %v1468_v61, 4 }
0x1f54   :  { %v1470_v63 = vadd.f32 %v1469_v62, %v1468_v61 }
0x1f56   :  { %v1471_v0 = vrot.slane %v1470_v63, 2 }
0x1f58   :  { %v1472_v15 = vadd.f32 %v1471_v0, %v1470_v63 }
0x1f5a   :  { %v1473_v1 = vrot.slane %v1472_v15, 1 }
0x1f5c   :  { %v1474_v2 = vadd.f32 %v1473_v1, %v1472_v15 }
0x1f5e   :  { %1846 = vpush %v1474_v2 }
0x1f8f   :  { %s1847_s10 = spop %1846 }
0x1f90   :  { %v1476_v4 = vstv %s1847_s10 }
0x1f91   :  { %v1477_v23 = vsub.f32 0.0, %v1476_v4 }
0x1f93   :  { %v1478_v5 = vmul.f32 0.5, %v1477_v23 }
0x1f95   :  { %1480 = vst.msk [vmem:[#allocation5] sm:$0x1] %vm1479_vm8, %v1478_v5 }
0x1f96   :  { %1941 = shalt.err (!%p1938_p12)
}
0x1f97   :  { %s1942_s17 = scalar_lea.hbm %s2376_s3, 16 }
0x1f98   :  { %p1943_p13 = scmp.ne.s32.totalorder %s2376_s3, %s1942_s17  ;;  %p1946_p0 = scmp.lt.u32.totalorder %s1942_s17, %s2376_s3 }
0x1f9a   :  { %p1948_p1 = pnand %p1946_p0, %p1943_p13 }
0x1f9c   :  { %1951 = shalt.err (!%p1948_p1)
}
0x1f9d   :  { %1500 = dma.vmem_to_hbm [thread:$0]  %s1498_s12, 16, %s2376_s3, [#allocation6]  }
0x1f9e   :  { %1952 = dma.done.wait [#allocation4], 32  }
0x1f9f   :  { %1953 = vsyncadd [#allocation4], 4294967264 }
0x1fa0   :  { %1954 = dma.done.wait [#allocation6], 16  }
0x1fa1   :  { %1955 = vsyncadd [#allocation6], 4294967280 }
0x1fa2   :  { %1507 = vsyncpa [#allocation4], 1 }
0x1fa3   :  { %1508 = vsyncpa [#allocation6], 1 }

</bundles_post_ra>
